<compile_context>
chip_gen: v7x
topology: tpu7x:2x2x1
jax: 0.10.0
libtpu: 0.0.40
codegen_flags: <defaults>
</compile_context>

<pallas_src>
import functools

import jax
import jax.numpy as jnp
from jax.experimental import pallas as pl
from jax.experimental.pallas import tpu as pltpu

BN_EPS = 1e-5        # nn.BatchNorm1d default eps
NORM_EPS = 1e-12     # F.normalize default eps

LANE = 128           # TPU lane width
SUBLANE = 8          # TPU sublane width


def _round_up(v, m):
    return (v + m - 1) // m * m


def _pad2d(a, rows, cols):
    return jnp.pad(a, ((0, rows - a.shape[0]), (0, cols - a.shape[1])))


# ----------------------------------------------------------------------------
# Fused Pallas kernel: all GCN layers + BN + ReLU + heads in one launch.
# ----------------------------------------------------------------------------
def _fused_forward_kernel(a_ref, x_ref,
                          w_all_ref, b_all_ref, gamma_all_ref, beta_all_ref,
                          we_ref, be_ref,
                          wp1a_ref, bp1a_ref, wp1b_ref, bp1b_ref,
                          wp2a_ref, bp2a_ref, wp2b_ref, bp2b_ref,
                          e1_ref, e2_ref, p1_ref, p2_ref,
                          *, num_layers, n_valid):
    n_pad = x_ref.shape[0]
    c_pad = w_all_ref.shape[1]          # padded channel width (128-multiple)
    inv_n = 1.0 / float(n_valid)

    # Mask of valid node rows: padded rows never feed real nodes (their
    # adjacency columns are zero) but must be excluded from the BN statistics.
    row_mask = (jax.lax.broadcasted_iota(jnp.int32, (n_pad, 1), 0)
                < n_valid).astype(jnp.float32)

    a0 = a_ref[0]                       # (n_pad, n_pad), loaded into VMEM once
    a1 = a_ref[1]

    h = x_ref[...]
    for layer in range(num_layers):
        # Both edge-type GCNConvs share one fused weight matmul, then two
        # aggregation matmuls summed (HeteroConv "sum" aggregation):
        #   XW = X @ [W0 | W1] ; y = A0 @ XW0 + A1 @ XW1 + (b0 + b1)
        xw = jnp.dot(h, w_all_ref[layer], preferred_element_type=jnp.float32)
        y = (jnp.dot(a0, xw[:, :c_pad], preferred_element_type=jnp.float32)
             + jnp.dot(a1, xw[:, c_pad:], preferred_element_type=jnp.float32)
             + b_all_ref[layer])

        # BatchNorm1d: training-mode batch stats (biased variance) over the
        # valid node rows only.
        mean = jnp.sum(y * row_mask, axis=0, keepdims=True) * inv_n
        cen = (y - mean) * row_mask
        var = jnp.sum(cen * cen, axis=0, keepdims=True) * inv_n
        y = (y - mean) * jax.lax.rsqrt(var + BN_EPS) * gamma_all_ref[layer] \
            + beta_all_ref[layer]

        if layer < num_layers - 1:
            y = jnp.maximum(y, 0.0)
            # TODO(synk): dropout(p=0.1, training) skipped (identity).
        h = y * row_mask                # zero the padded rows

    # embedding1 / embedding2 fused (same input): tanh(X @ [We1 | We2] + b)
    ec = jnp.tanh(jnp.dot(h, we_ref[...], preferred_element_type=jnp.float32)
                  + be_ref[...])
    e1 = ec[:, :c_pad]
    e2 = ec[:, c_pad:]

    def l2norm(v):
        # F.normalize: v / max(||v||, eps) == v * rsqrt(max(||v||^2, eps^2))
        ss = jnp.sum(v * v, axis=1, keepdims=True)
        return v * jax.lax.rsqrt(jnp.maximum(ss, NORM_EPS * NORM_EPS))

    e2n = l2norm(e2)

    # projection_head1(e1): Linear -> ReLU -> Linear, then normalize
    h1 = jnp.maximum(
        jnp.dot(e1, wp1a_ref[...], preferred_element_type=jnp.float32)
        + bp1a_ref[...], 0.0)
    p1 = jnp.dot(h1, wp1b_ref[...],
                 preferred_element_type=jnp.float32) + bp1b_ref[...]

    # projection_head2(normalized e2): Linear -> ReLU -> Linear, then normalize
    h2 = jnp.maximum(
        jnp.dot(e2n, wp2a_ref[...], preferred_element_type=jnp.float32)
        + bp2a_ref[...], 0.0)
    p2 = jnp.dot(h2, wp2b_ref[...],
                 preferred_element_type=jnp.float32) + bp2b_ref[...]

    e1_ref[...] = e1
    e2_ref[...] = e2n
    p1_ref[...] = l2norm(p1)
    p2_ref[...] = l2norm(p2)


_VMEM = pl.BlockSpec(memory_space=pltpu.MemorySpace.VMEM)


# ----------------------------------------------------------------------------
# Glue: dense GCN-normalized adjacency per edge type (plain JAX, host/XLA side)
# ----------------------------------------------------------------------------
def build_norm_adj(edge_index, edge_mask, num_nodes):
    """D^-1/2 (A + I) D^-1/2 with A[dst, src] = 1 for masked edges."""
    src = edge_index[0]
    dst = edge_index[1]
    a = jnp.zeros((num_nodes, num_nodes), dtype=jnp.float32)
    a = a.at[dst, src].add(edge_mask.astype(jnp.float32))
    a = a + jnp.eye(num_nodes, dtype=jnp.float32)        # add_self_loops
    deg = jnp.sum(a, axis=1)                              # in-degree (+ self loop)
    dinv = jax.lax.rsqrt(deg)
    return a * dinv[:, None] * dinv[None, :]


# ----------------------------------------------------------------------------
# Parameter init (deterministic, synthetic; true/unpadded PyTorch-like shapes)
# ----------------------------------------------------------------------------
def init_params(key, in_c, hid_c, out_c, num_layers, proj_c):
    dims = [in_c] + [hid_c] * (num_layers - 1) + [out_c]
    params = {"layers": []}

    def nrm(k, shape, scale=0.1):
        return (scale * jax.random.normal(k, shape)).astype(jnp.float32)

    for i in range(num_layers):
        cin, cout = dims[i], dims[i + 1]
        key, k0, k1, k2, k3 = jax.random.split(key, 5)
        params["layers"].append({
            "w0": nrm(k0, (cin, cout)), "b0": nrm(k1, (1, cout)),
            "w1": nrm(k2, (cin, cout)), "b1": nrm(k3, (1, cout)),
            "gamma": jnp.ones((1, cout), jnp.float32),
            "beta": jnp.zeros((1, cout), jnp.float32),
        })

    key, *ks = jax.random.split(key, 13)
    params.update({
        "we1": nrm(ks[0], (out_c, out_c)),  "be1": nrm(ks[1], (1, out_c)),
        "we2": nrm(ks[2], (out_c, out_c)),  "be2": nrm(ks[3], (1, out_c)),
        "wp1a": nrm(ks[4], (out_c, hid_c)), "bp1a": nrm(ks[5], (1, hid_c)),
        "wp1b": nrm(ks[6], (hid_c, proj_c)), "bp1b": nrm(ks[7], (1, proj_c)),
        "wp2a": nrm(ks[8], (out_c, hid_c)), "bp2a": nrm(ks[9], (1, hid_c)),
        "wp2b": nrm(ks[10], (hid_c, proj_c)), "bp2b": nrm(ks[11], (1, proj_c)),
    })
    return params


# ----------------------------------------------------------------------------
# Full forward: host-side padding / fusion prep + one pallas_call
# ----------------------------------------------------------------------------
def cluster_gcn_forward(params, x, edge_index, edge_type, num_layers):
    n, in_c = x.shape
    hid_c = params["layers"][0]["w0"].shape[1]
    out_c = params["we1"].shape[0]
    proj_c = params["wp1b"].shape[1]

    # Unified padded channel width (lane-dense everywhere).
    c_pad = _round_up(max(in_c, hid_c, out_c, proj_c), LANE)
    n_pad = _round_up(max(n, SUBLANE), SUBLANE)

    # ----- per-edge-type padded normalized adjacency, stacked (2, n, n) -----
    a0 = _pad2d(build_norm_adj(edge_index, edge_type == 0, n), n_pad, n_pad)
    a1 = _pad2d(build_norm_adj(edge_index, edge_type == 1, n), n_pad, n_pad)
    a_stack = jnp.stack([a0, a1], axis=0)                 # (2, n_pad, n_pad) f32

    xp = _pad2d(x, n_pad, c_pad)

    # ----- stack per-layer fused weights: (L, c_pad, 2*c_pad) ---------------
    w_all, b_all, g_all, bt_all = [], [], [], []
    for lp in params["layers"]:
        w0 = _pad2d(lp["w0"], c_pad, c_pad)
        w1 = _pad2d(lp["w1"], c_pad, c_pad)
        w_all.append(jnp.concatenate([w0, w1], axis=1))
        b_all.append(_pad2d(lp["b0"] + lp["b1"], 1, c_pad))   # HeteroConv sum
        g_all.append(_pad2d(lp["gamma"], 1, c_pad))           # padded gamma = 0
        bt_all.append(_pad2d(lp["beta"], 1, c_pad))
    w_all = jnp.stack(w_all)
    b_all = jnp.stack(b_all)
    g_all = jnp.stack(g_all)
    bt_all = jnp.stack(bt_all)

    # ----- heads: fuse the two embedding layers (same input) ----------------
    we = jnp.concatenate([_pad2d(params["we1"], c_pad, c_pad),
                          _pad2d(params["we2"], c_pad, c_pad)], axis=1)
    be = jnp.concatenate([_pad2d(params["be1"], 1, c_pad),
                          _pad2d(params["be2"], 1, c_pad)], axis=1)
    wp1a = _pad2d(params["wp1a"], c_pad, c_pad)
    bp1a = _pad2d(params["bp1a"], 1, c_pad)
    wp1b = _pad2d(params["wp1b"], c_pad, c_pad)
    bp1b = _pad2d(params["bp1b"], 1, c_pad)
    wp2a = _pad2d(params["wp2a"], c_pad, c_pad)
    bp2a = _pad2d(params["bp2a"], 1, c_pad)
    wp2b = _pad2d(params["wp2b"], c_pad, c_pad)
    bp2b = _pad2d(params["bp2b"], 1, c_pad)

    args = (a_stack, xp, w_all, b_all, g_all, bt_all, we, be,
            wp1a, bp1a, wp1b, bp1b, wp2a, bp2a, wp2b, bp2b)

    # Advisory cost estimate so XLA schedules the call sensibly.
    flops = (num_layers * (2 * n_pad * c_pad * 2 * c_pad        # X @ [W0|W1]
                           + 2 * 2 * n_pad * n_pad * c_pad)      # A0/A1 @ XW
             + 2 * n_pad * c_pad * 2 * c_pad                     # embeddings
             + 4 * 2 * n_pad * c_pad * c_pad)                    # projection heads
    transcendentals = n_pad * 2 * c_pad + 4 * n_pad + num_layers * c_pad
    in_bytes = sum(int(a.size) * a.dtype.itemsize for a in args)
    out_bytes = 4 * n_pad * c_pad * 4
    cost = pl.CostEstimate(flops=int(flops),
                           transcendentals=int(transcendentals),
                           bytes_accessed=int(in_bytes + out_bytes))

    kernel = functools.partial(_fused_forward_kernel,
                               num_layers=num_layers, n_valid=n)
    out_shape = (jax.ShapeDtypeStruct((n_pad, c_pad), jnp.float32),) * 4
    e1p, e2p, p1p, p2p = pl.pallas_call(
        kernel,
        out_shape=out_shape,
        in_specs=[_VMEM] * len(args),
        out_specs=(_VMEM,) * 4,
        compiler_params=pltpu.CompilerParams(
            vmem_limit_bytes=64 * 1024 * 1024),
        cost_estimate=cost,
    )(*args)

    # Strip padding back to the true output shapes.
    return (e1p[:n, :out_c], e2p[:n, :out_c],
            p1p[:n, :proj_c], p2p[:n, :proj_c])


# ----------------------------------------------------------------------------
if __name__ == "__main__":
    IN_C, HID_C, OUT_C, NUM_LAYERS = 8, 32, 16, 3
    PROJ_C = OUT_C          # projection_dim=None -> out_channels
    N_NODES, N_EDGES = 16, 40

    key = jax.random.PRNGKey(0)
    key, kx, ksrc, kdst, ktyp, kp = jax.random.split(key, 6)

    x = jax.random.normal(kx, (N_NODES, IN_C), dtype=jnp.float32)
    edge_index = jnp.stack([
        jax.random.randint(ksrc, (N_EDGES,), 0, N_NODES),
        jax.random.randint(kdst, (N_EDGES,), 0, N_NODES),
    ], axis=0)                                    # (2, E)
    edge_type = jax.random.randint(ktyp, (N_EDGES,), 0, 2)

    params = init_params(kp, IN_C, HID_C, OUT_C, NUM_LAYERS, PROJ_C)

    fwd = jax.jit(functools.partial(cluster_gcn_forward, num_layers=NUM_LAYERS))
    emb1, emb2, proj1, proj2 = fwd(params, x, edge_index, edge_type)
    jax.block_until_ready((emb1, emb2, proj1, proj2))

    assert emb1.shape == (N_NODES, OUT_C)
    assert emb2.shape == (N_NODES, OUT_C)
    assert proj1.shape == (N_NODES, PROJ_C)
    assert proj2.shape == (N_NODES, PROJ_C)
    assert all(bool(jnp.all(jnp.isfinite(t))) for t in (emb1, emb2, proj1, proj2))
    # normalized outputs should have unit row norms
    assert bool(jnp.allclose(jnp.linalg.norm(emb2, axis=1), 1.0, atol=1e-3))
    assert bool(jnp.allclose(jnp.linalg.norm(proj1, axis=1), 1.0, atol=1e-3))
    assert bool(jnp.allclose(jnp.linalg.norm(proj2, axis=1), 1.0, atol=1e-3))

    print("KERNEL_OK")
</pallas_src>

<mosaic_0001>
module attributes {stable_mosaic.version = 11 : i64} {
  func.func @_fused_forward_kernel(%arg0: memref<2x16x16xf32, #tpu.memory_space<vmem>>, %arg1: memref<16x128xf32, #tpu.memory_space<vmem>>, %arg2: memref<3x128x256xf32, #tpu.memory_space<vmem>>, %arg3: memref<3x1x128xf32, #tpu.memory_space<vmem>>, %arg4: memref<3x1x128xf32, #tpu.memory_space<vmem>>, %arg5: memref<3x1x128xf32, #tpu.memory_space<vmem>>, %arg6: memref<128x256xf32, #tpu.memory_space<vmem>>, %arg7: memref<1x256xf32, #tpu.memory_space<vmem>>, %arg8: memref<128x128xf32, #tpu.memory_space<vmem>>, %arg9: memref<1x128xf32, #tpu.memory_space<vmem>>, %arg10: memref<128x128xf32, #tpu.memory_space<vmem>>, %arg11: memref<1x128xf32, #tpu.memory_space<vmem>>, %arg12: memref<128x128xf32, #tpu.memory_space<vmem>>, %arg13: memref<1x128xf32, #tpu.memory_space<vmem>>, %arg14: memref<128x128xf32, #tpu.memory_space<vmem>>, %arg15: memref<1x128xf32, #tpu.memory_space<vmem>>, %arg16: memref<16x128xf32, #tpu.memory_space<vmem>>, %arg17: memref<16x128xf32, #tpu.memory_space<vmem>>, %arg18: memref<16x128xf32, #tpu.memory_space<vmem>>, %arg19: memref<16x128xf32, #tpu.memory_space<vmem>>) attributes {dimension_semantics = [], scalar_prefetch = 0 : i64, scratch_operands = 0 : i64, tpu.core_type = #tpu.core_type<tc>} {
    %0 = tpu.iota {dimensions = array<i32: 0>} : vector<16x1xi32>
    %c16_i32 = arith.constant 16 : i32
    %1 = vector.broadcast %c16_i32 : i32 to vector<16x1xi32>
    %2 = arith.cmpi slt, %0, %1 : vector<16x1xi32>
    %3 = arith.extui %2 : vector<16x1xi1> to vector<16x1xi32>
    %4 = arith.sitofp %3 : vector<16x1xi32> to vector<16x1xf32>
    %c0 = arith.constant 0 : index
    %c0_0 = arith.constant 0 : index
    %c0_1 = arith.constant 0 : index
    %5 = vector.load %arg0[%c0, %c0_0, %c0_1] : memref<2x16x16xf32, #tpu.memory_space<vmem>>, vector<1x16x16xf32>
    %6 = vector.shape_cast %5 : vector<1x16x16xf32> to vector<16x16xf32>
    %c1 = arith.constant 1 : index
    %c0_2 = arith.constant 0 : index
    %c0_3 = arith.constant 0 : index
    %7 = vector.load %arg0[%c1, %c0_2, %c0_3] : memref<2x16x16xf32, #tpu.memory_space<vmem>>, vector<1x16x16xf32>
    %8 = vector.shape_cast %7 : vector<1x16x16xf32> to vector<16x16xf32>
    %c0_4 = arith.constant 0 : index
    %c0_5 = arith.constant 0 : index
    %9 = vector.load %arg1[%c0_4, %c0_5] : memref<16x128xf32, #tpu.memory_space<vmem>>, vector<16x128xf32>
    %c0_6 = arith.constant 0 : index
    %c0_7 = arith.constant 0 : index
    %c0_8 = arith.constant 0 : index
    %10 = vector.load %arg2[%c0_6, %c0_7, %c0_8] : memref<3x128x256xf32, #tpu.memory_space<vmem>>, vector<1x128x256xf32>
    %11 = vector.shape_cast %10 : vector<1x128x256xf32> to vector<128x256xf32>
    %cst = arith.constant dense<0.000000e+00> : vector<16x256xf32>
    %12 = tpu.matmul %9, %11, %cst {dimension_numbers = #tpu.dot_dimension_numbers<[1], [0], [0], [1], [0, 0, 1, 1], [], []>} : vector<16x128xf32>, vector<128x256xf32>, vector<16x256xf32> -> vector<16x256xf32>
    %13 = vector.extract_strided_slice %12 {offsets = [0, 0], sizes = [16, 128], strides = [1, 1]} : vector<16x256xf32> to vector<16x128xf32>
    %cst_9 = arith.constant dense<0.000000e+00> : vector<16x128xf32>
    %14 = tpu.matmul %6, %13, %cst_9 {dimension_numbers = #tpu.dot_dimension_numbers<[1], [0], [0], [1], [0, 0, 1, 1], [], []>} : vector<16x16xf32>, vector<16x128xf32>, vector<16x128xf32> -> vector<16x128xf32>
    %15 = vector.extract_strided_slice %12 {offsets = [0, 128], sizes = [16, 128], strides = [1, 1]} : vector<16x256xf32> to vector<16x128xf32>
    %cst_10 = arith.constant dense<0.000000e+00> : vector<16x128xf32>
    %16 = tpu.matmul %8, %15, %cst_10 {dimension_numbers = #tpu.dot_dimension_numbers<[1], [0], [0], [1], [0, 0, 1, 1], [], []>} : vector<16x16xf32>, vector<16x128xf32>, vector<16x128xf32> -> vector<16x128xf32>
    %17 = arith.addf %14, %16 : vector<16x128xf32>
    %c0_11 = arith.constant 0 : index
    %c0_12 = arith.constant 0 : index
    %c0_13 = arith.constant 0 : index
    %18 = vector.load %arg3[%c0_11, %c0_12, %c0_13] : memref<3x1x128xf32, #tpu.memory_space<vmem>>, vector<1x1x128xf32>
    %19 = vector.shape_cast %18 : vector<1x1x128xf32> to vector<1x128xf32>
    %20 = vector.broadcast %19 : vector<1x128xf32> to vector<16x128xf32>
    %21 = arith.addf %17, %20 : vector<16x128xf32>
    %22 = vector.broadcast %4 : vector<16x1xf32> to vector<16x128xf32>
    %23 = arith.mulf %21, %22 : vector<16x128xf32>
    %cst_14 = arith.constant dense<0.000000e+00> : vector<128xf32>
    %24 = vector.multi_reduction <add>, %23, %cst_14 [0] : vector<16x128xf32> to vector<128xf32>
    %25 = vector.shape_cast %24 : vector<128xf32> to vector<1x128xf32>
    %cst_15 = arith.constant 6.250000e-02 : f32
    %26 = vector.broadcast %cst_15 : f32 to vector<1x128xf32>
    %27 = arith.mulf %25, %26 : vector<1x128xf32>
    %28 = vector.broadcast %27 : vector<1x128xf32> to vector<16x128xf32>
    %29 = arith.subf %21, %28 : vector<16x128xf32>
    %30 = vector.broadcast %4 : vector<16x1xf32> to vector<16x128xf32>
    %31 = arith.mulf %29, %30 : vector<16x128xf32>
    %32 = arith.mulf %31, %31 : vector<16x128xf32>
    %cst_16 = arith.constant dense<0.000000e+00> : vector<128xf32>
    %33 = vector.multi_reduction <add>, %32, %cst_16 [0] : vector<16x128xf32> to vector<128xf32>
    %34 = vector.shape_cast %33 : vector<128xf32> to vector<1x128xf32>
    %cst_17 = arith.constant 6.250000e-02 : f32
    %35 = vector.broadcast %cst_17 : f32 to vector<1x128xf32>
    %36 = arith.mulf %34, %35 : vector<1x128xf32>
    %37 = vector.broadcast %27 : vector<1x128xf32> to vector<16x128xf32>
    %38 = arith.subf %21, %37 : vector<16x128xf32>
    %cst_18 = arith.constant 9.99999974E-6 : f32
    %39 = vector.broadcast %cst_18 : f32 to vector<1x128xf32>
    %40 = arith.addf %36, %39 : vector<1x128xf32>
    %41 = math.rsqrt %40 : vector<1x128xf32>
    %42 = vector.broadcast %41 : vector<1x128xf32> to vector<16x128xf32>
    %43 = arith.mulf %38, %42 : vector<16x128xf32>
    %c0_19 = arith.constant 0 : index
    %c0_20 = arith.constant 0 : index
    %c0_21 = arith.constant 0 : index
    %44 = vector.load %arg4[%c0_19, %c0_20, %c0_21] : memref<3x1x128xf32, #tpu.memory_space<vmem>>, vector<1x1x128xf32>
    %45 = vector.shape_cast %44 : vector<1x1x128xf32> to vector<1x128xf32>
    %46 = vector.broadcast %45 : vector<1x128xf32> to vector<16x128xf32>
    %47 = arith.mulf %43, %46 : vector<16x128xf32>
    %c0_22 = arith.constant 0 : index
    %c0_23 = arith.constant 0 : index
    %c0_24 = arith.constant 0 : index
    %48 = vector.load %arg5[%c0_22, %c0_23, %c0_24] : memref<3x1x128xf32, #tpu.memory_space<vmem>>, vector<1x1x128xf32>
    %49 = vector.shape_cast %48 : vector<1x1x128xf32> to vector<1x128xf32>
    %50 = vector.broadcast %49 : vector<1x128xf32> to vector<16x128xf32>
    %51 = arith.addf %47, %50 : vector<16x128xf32>
    %cst_25 = arith.constant 0.000000e+00 : f32
    %52 = vector.broadcast %cst_25 : f32 to vector<16x128xf32>
    %53 = arith.maximumf %51, %52 : vector<16x128xf32>
    %54 = vector.broadcast %4 : vector<16x1xf32> to vector<16x128xf32>
    %55 = arith.mulf %53, %54 : vector<16x128xf32>
    %c1_26 = arith.constant 1 : index
    %c0_27 = arith.constant 0 : index
    %c0_28 = arith.constant 0 : index
    %56 = vector.load %arg2[%c1_26, %c0_27, %c0_28] : memref<3x128x256xf32, #tpu.memory_space<vmem>>, vector<1x128x256xf32>
    %57 = vector.shape_cast %56 : vector<1x128x256xf32> to vector<128x256xf32>
    %cst_29 = arith.constant dense<0.000000e+00> : vector<16x256xf32>
    %58 = tpu.matmul %55, %57, %cst_29 {dimension_numbers = #tpu.dot_dimension_numbers<[1], [0], [0], [1], [0, 0, 1, 1], [], []>} : vector<16x128xf32>, vector<128x256xf32>, vector<16x256xf32> -> vector<16x256xf32>
    %59 = vector.extract_strided_slice %58 {offsets = [0, 0], sizes = [16, 128], strides = [1, 1]} : vector<16x256xf32> to vector<16x128xf32>
    %cst_30 = arith.constant dense<0.000000e+00> : vector<16x128xf32>
    %60 = tpu.matmul %6, %59, %cst_30 {dimension_numbers = #tpu.dot_dimension_numbers<[1], [0], [0], [1], [0, 0, 1, 1], [], []>} : vector<16x16xf32>, vector<16x128xf32>, vector<16x128xf32> -> vector<16x128xf32>
    %61 = vector.extract_strided_slice %58 {offsets = [0, 128], sizes = [16, 128], strides = [1, 1]} : vector<16x256xf32> to vector<16x128xf32>
    %cst_31 = arith.constant dense<0.000000e+00> : vector<16x128xf32>
    %62 = tpu.matmul %8, %61, %cst_31 {dimension_numbers = #tpu.dot_dimension_numbers<[1], [0], [0], [1], [0, 0, 1, 1], [], []>} : vector<16x16xf32>, vector<16x128xf32>, vector<16x128xf32> -> vector<16x128xf32>
    %63 = arith.addf %60, %62 : vector<16x128xf32>
    %c1_32 = arith.constant 1 : index
    %c0_33 = arith.constant 0 : index
    %c0_34 = arith.constant 0 : index
    %64 = vector.load %arg3[%c1_32, %c0_33, %c0_34] : memref<3x1x128xf32, #tpu.memory_space<vmem>>, vector<1x1x128xf32>
    %65 = vector.shape_cast %64 : vector<1x1x128xf32> to vector<1x128xf32>
    %66 = vector.broadcast %65 : vector<1x128xf32> to vector<16x128xf32>
    %67 = arith.addf %63, %66 : vector<16x128xf32>
    %68 = vector.broadcast %4 : vector<16x1xf32> to vector<16x128xf32>
    %69 = arith.mulf %67, %68 : vector<16x128xf32>
    %cst_35 = arith.constant dense<0.000000e+00> : vector<128xf32>
    %70 = vector.multi_reduction <add>, %69, %cst_35 [0] : vector<16x128xf32> to vector<128xf32>
    %71 = vector.shape_cast %70 : vector<128xf32> to vector<1x128xf32>
    %cst_36 = arith.constant 6.250000e-02 : f32
    %72 = vector.broadcast %cst_36 : f32 to vector<1x128xf32>
    %73 = arith.mulf %71, %72 : vector<1x128xf32>
    %74 = vector.broadcast %73 : vector<1x128xf32> to vector<16x128xf32>
    %75 = arith.subf %67, %74 : vector<16x128xf32>
    %76 = vector.broadcast %4 : vector<16x1xf32> to vector<16x128xf32>
    %77 = arith.mulf %75, %76 : vector<16x128xf32>
    %78 = arith.mulf %77, %77 : vector<16x128xf32>
    %cst_37 = arith.constant dense<0.000000e+00> : vector<128xf32>
    %79 = vector.multi_reduction <add>, %78, %cst_37 [0] : vector<16x128xf32> to vector<128xf32>
    %80 = vector.shape_cast %79 : vector<128xf32> to vector<1x128xf32>
    %cst_38 = arith.constant 6.250000e-02 : f32
    %81 = vector.broadcast %cst_38 : f32 to vector<1x128xf32>
    %82 = arith.mulf %80, %81 : vector<1x128xf32>
    %83 = vector.broadcast %73 : vector<1x128xf32> to vector<16x128xf32>
    %84 = arith.subf %67, %83 : vector<16x128xf32>
    %cst_39 = arith.constant 9.99999974E-6 : f32
    %85 = vector.broadcast %cst_39 : f32 to vector<1x128xf32>
    %86 = arith.addf %82, %85 : vector<1x128xf32>
    %87 = math.rsqrt %86 : vector<1x128xf32>
    %88 = vector.broadcast %87 : vector<1x128xf32> to vector<16x128xf32>
    %89 = arith.mulf %84, %88 : vector<16x128xf32>
    %c1_40 = arith.constant 1 : index
    %c0_41 = arith.constant 0 : index
    %c0_42 = arith.constant 0 : index
    %90 = vector.load %arg4[%c1_40, %c0_41, %c0_42] : memref<3x1x128xf32, #tpu.memory_space<vmem>>, vector<1x1x128xf32>
    %91 = vector.shape_cast %90 : vector<1x1x128xf32> to vector<1x128xf32>
    %92 = vector.broadcast %91 : vector<1x128xf32> to vector<16x128xf32>
    %93 = arith.mulf %89, %92 : vector<16x128xf32>
    %c1_43 = arith.constant 1 : index
    %c0_44 = arith.constant 0 : index
    %c0_45 = arith.constant 0 : index
    %94 = vector.load %arg5[%c1_43, %c0_44, %c0_45] : memref<3x1x128xf32, #tpu.memory_space<vmem>>, vector<1x1x128xf32>
    %95 = vector.shape_cast %94 : vector<1x1x128xf32> to vector<1x128xf32>
    %96 = vector.broadcast %95 : vector<1x128xf32> to vector<16x128xf32>
    %97 = arith.addf %93, %96 : vector<16x128xf32>
    %cst_46 = arith.constant 0.000000e+00 : f32
    %98 = vector.broadcast %cst_46 : f32 to vector<16x128xf32>
    %99 = arith.maximumf %97, %98 : vector<16x128xf32>
    %100 = vector.broadcast %4 : vector<16x1xf32> to vector<16x128xf32>
    %101 = arith.mulf %99, %100 : vector<16x128xf32>
    %c2 = arith.constant 2 : index
    %c0_47 = arith.constant 0 : index
    %c0_48 = arith.constant 0 : index
    %102 = vector.load %arg2[%c2, %c0_47, %c0_48] : memref<3x128x256xf32, #tpu.memory_space<vmem>>, vector<1x128x256xf32>
    %103 = vector.shape_cast %102 : vector<1x128x256xf32> to vector<128x256xf32>
    %cst_49 = arith.constant dense<0.000000e+00> : vector<16x256xf32>
    %104 = tpu.matmul %101, %103, %cst_49 {dimension_numbers = #tpu.dot_dimension_numbers<[1], [0], [0], [1], [0, 0, 1, 1], [], []>} : vector<16x128xf32>, vector<128x256xf32>, vector<16x256xf32> -> vector<16x256xf32>
    %105 = vector.extract_strided_slice %104 {offsets = [0, 0], sizes = [16, 128], strides = [1, 1]} : vector<16x256xf32> to vector<16x128xf32>
    %cst_50 = arith.constant dense<0.000000e+00> : vector<16x128xf32>
    %106 = tpu.matmul %6, %105, %cst_50 {dimension_numbers = #tpu.dot_dimension_numbers<[1], [0], [0], [1], [0, 0, 1, 1], [], []>} : vector<16x16xf32>, vector<16x128xf32>, vector<16x128xf32> -> vector<16x128xf32>
    %107 = vector.extract_strided_slice %104 {offsets = [0, 128], sizes = [16, 128], strides = [1, 1]} : vector<16x256xf32> to vector<16x128xf32>
    %cst_51 = arith.constant dense<0.000000e+00> : vector<16x128xf32>
    %108 = tpu.matmul %8, %107, %cst_51 {dimension_numbers = #tpu.dot_dimension_numbers<[1], [0], [0], [1], [0, 0, 1, 1], [], []>} : vector<16x16xf32>, vector<16x128xf32>, vector<16x128xf32> -> vector<16x128xf32>
    %109 = arith.addf %106, %108 : vector<16x128xf32>
    %c2_52 = arith.constant 2 : index
    %c0_53 = arith.constant 0 : index
    %c0_54 = arith.constant 0 : index
    %110 = vector.load %arg3[%c2_52, %c0_53, %c0_54] : memref<3x1x128xf32, #tpu.memory_space<vmem>>, vector<1x1x128xf32>
    %111 = vector.shape_cast %110 : vector<1x1x128xf32> to vector<1x128xf32>
    %112 = vector.broadcast %111 : vector<1x128xf32> to vector<16x128xf32>
    %113 = arith.addf %109, %112 : vector<16x128xf32>
    %114 = vector.broadcast %4 : vector<16x1xf32> to vector<16x128xf32>
    %115 = arith.mulf %113, %114 : vector<16x128xf32>
    %cst_55 = arith.constant dense<0.000000e+00> : vector<128xf32>
    %116 = vector.multi_reduction <add>, %115, %cst_55 [0] : vector<16x128xf32> to vector<128xf32>
    %117 = vector.shape_cast %116 : vector<128xf32> to vector<1x128xf32>
    %cst_56 = arith.constant 6.250000e-02 : f32
    %118 = vector.broadcast %cst_56 : f32 to vector<1x128xf32>
    %119 = arith.mulf %117, %118 : vector<1x128xf32>
    %120 = vector.broadcast %119 : vector<1x128xf32> to vector<16x128xf32>
    %121 = arith.subf %113, %120 : vector<16x128xf32>
    %122 = vector.broadcast %4 : vector<16x1xf32> to vector<16x128xf32>
    %123 = arith.mulf %121, %122 : vector<16x128xf32>
    %124 = arith.mulf %123, %123 : vector<16x128xf32>
    %cst_57 = arith.constant dense<0.000000e+00> : vector<128xf32>
    %125 = vector.multi_reduction <add>, %124, %cst_57 [0] : vector<16x128xf32> to vector<128xf32>
    %126 = vector.shape_cast %125 : vector<128xf32> to vector<1x128xf32>
    %cst_58 = arith.constant 6.250000e-02 : f32
    %127 = vector.broadcast %cst_58 : f32 to vector<1x128xf32>
    %128 = arith.mulf %126, %127 : vector<1x128xf32>
    %129 = vector.broadcast %119 : vector<1x128xf32> to vector<16x128xf32>
    %130 = arith.subf %113, %129 : vector<16x128xf32>
    %cst_59 = arith.constant 9.99999974E-6 : f32
    %131 = vector.broadcast %cst_59 : f32 to vector<1x128xf32>
    %132 = arith.addf %128, %131 : vector<1x128xf32>
    %133 = math.rsqrt %132 : vector<1x128xf32>
    %134 = vector.broadcast %133 : vector<1x128xf32> to vector<16x128xf32>
    %135 = arith.mulf %130, %134 : vector<16x128xf32>
    %c2_60 = arith.constant 2 : index
    %c0_61 = arith.constant 0 : index
    %c0_62 = arith.constant 0 : index
    %136 = vector.load %arg4[%c2_60, %c0_61, %c0_62] : memref<3x1x128xf32, #tpu.memory_space<vmem>>, vector<1x1x128xf32>
    %137 = vector.shape_cast %136 : vector<1x1x128xf32> to vector<1x128xf32>
    %138 = vector.broadcast %137 : vector<1x128xf32> to vector<16x128xf32>
    %139 = arith.mulf %135, %138 : vector<16x128xf32>
    %c2_63 = arith.constant 2 : index
    %c0_64 = arith.constant 0 : index
    %c0_65 = arith.constant 0 : index
    %140 = vector.load %arg5[%c2_63, %c0_64, %c0_65] : memref<3x1x128xf32, #tpu.memory_space<vmem>>, vector<1x1x128xf32>
    %141 = vector.shape_cast %140 : vector<1x1x128xf32> to vector<1x128xf32>
    %142 = vector.broadcast %141 : vector<1x128xf32> to vector<16x128xf32>
    %143 = arith.addf %139, %142 : vector<16x128xf32>
    %144 = vector.broadcast %4 : vector<16x1xf32> to vector<16x128xf32>
    %145 = arith.mulf %143, %144 : vector<16x128xf32>
    %c0_66 = arith.constant 0 : index
    %c0_67 = arith.constant 0 : index
    %146 = vector.load %arg6[%c0_66, %c0_67] : memref<128x256xf32, #tpu.memory_space<vmem>>, vector<128x256xf32>
    %cst_68 = arith.constant dense<0.000000e+00> : vector<16x256xf32>
    %147 = tpu.matmul %145, %146, %cst_68 {dimension_numbers = #tpu.dot_dimension_numbers<[1], [0], [0], [1], [0, 0, 1, 1], [], []>} : vector<16x128xf32>, vector<128x256xf32>, vector<16x256xf32> -> vector<16x256xf32>
    %c0_69 = arith.constant 0 : index
    %c0_70 = arith.constant 0 : index
    %148 = vector.load %arg7[%c0_69, %c0_70] : memref<1x256xf32, #tpu.memory_space<vmem>>, vector<1x256xf32>
    %149 = vector.broadcast %148 : vector<1x256xf32> to vector<16x256xf32>
    %150 = arith.addf %147, %149 : vector<16x256xf32>
    %151 = math.tanh %150 : vector<16x256xf32>
    %152 = vector.extract_strided_slice %151 {offsets = [0, 0], sizes = [16, 128], strides = [1, 1]} : vector<16x256xf32> to vector<16x128xf32>
    %153 = vector.extract_strided_slice %151 {offsets = [0, 128], sizes = [16, 128], strides = [1, 1]} : vector<16x256xf32> to vector<16x128xf32>
    %154 = arith.mulf %153, %153 : vector<16x128xf32>
    %cst_71 = arith.constant dense<0.000000e+00> : vector<16xf32>
    %155 = vector.multi_reduction <add>, %154, %cst_71 [1] : vector<16x128xf32> to vector<16xf32>
    %156 = vector.shape_cast %155 : vector<16xf32> to vector<16x1xf32>
    %cst_72 = arith.constant 1.000000e-24 : f32
    %157 = vector.broadcast %cst_72 : f32 to vector<16x1xf32>
    %158 = arith.maximumf %156, %157 : vector<16x1xf32>
    %159 = math.rsqrt %158 : vector<16x1xf32>
    %160 = vector.broadcast %159 : vector<16x1xf32> to vector<16x128xf32>
    %161 = arith.mulf %153, %160 : vector<16x128xf32>
    %c0_73 = arith.constant 0 : index
    %c0_74 = arith.constant 0 : index
    %162 = vector.load %arg8[%c0_73, %c0_74] : memref<128x128xf32, #tpu.memory_space<vmem>>, vector<128x128xf32>
    %cst_75 = arith.constant dense<0.000000e+00> : vector<16x128xf32>
    %163 = tpu.matmul %152, %162, %cst_75 {dimension_numbers = #tpu.dot_dimension_numbers<[1], [0], [0], [1], [0, 0, 1, 1], [], []>} : vector<16x128xf32>, vector<128x128xf32>, vector<16x128xf32> -> vector<16x128xf32>
    %c0_76 = arith.constant 0 : index
    %c0_77 = arith.constant 0 : index
    %164 = vector.load %arg9[%c0_76, %c0_77] : memref<1x128xf32, #tpu.memory_space<vmem>>, vector<1x128xf32>
    %165 = vector.broadcast %164 : vector<1x128xf32> to vector<16x128xf32>
    %166 = arith.addf %163, %165 : vector<16x128xf32>
    %cst_78 = arith.constant 0.000000e+00 : f32
    %167 = vector.broadcast %cst_78 : f32 to vector<16x128xf32>
    %168 = arith.maximumf %166, %167 : vector<16x128xf32>
    %c0_79 = arith.constant 0 : index
    %c0_80 = arith.constant 0 : index
    %169 = vector.load %arg10[%c0_79, %c0_80] : memref<128x128xf32, #tpu.memory_space<vmem>>, vector<128x128xf32>
    %cst_81 = arith.constant dense<0.000000e+00> : vector<16x128xf32>
    %170 = tpu.matmul %168, %169, %cst_81 {dimension_numbers = #tpu.dot_dimension_numbers<[1], [0], [0], [1], [0, 0, 1, 1], [], []>} : vector<16x128xf32>, vector<128x128xf32>, vector<16x128xf32> -> vector<16x128xf32>
    %c0_82 = arith.constant 0 : index
    %c0_83 = arith.constant 0 : index
    %171 = vector.load %arg11[%c0_82, %c0_83] : memref<1x128xf32, #tpu.memory_space<vmem>>, vector<1x128xf32>
    %172 = vector.broadcast %171 : vector<1x128xf32> to vector<16x128xf32>
    %173 = arith.addf %170, %172 : vector<16x128xf32>
    %c0_84 = arith.constant 0 : index
    %c0_85 = arith.constant 0 : index
    %174 = vector.load %arg12[%c0_84, %c0_85] : memref<128x128xf32, #tpu.memory_space<vmem>>, vector<128x128xf32>
    %cst_86 = arith.constant dense<0.000000e+00> : vector<16x128xf32>
    %175 = tpu.matmul %161, %174, %cst_86 {dimension_numbers = #tpu.dot_dimension_numbers<[1], [0], [0], [1], [0, 0, 1, 1], [], []>} : vector<16x128xf32>, vector<128x128xf32>, vector<16x128xf32> -> vector<16x128xf32>
    %c0_87 = arith.constant 0 : index
    %c0_88 = arith.constant 0 : index
    %176 = vector.load %arg13[%c0_87, %c0_88] : memref<1x128xf32, #tpu.memory_space<vmem>>, vector<1x128xf32>
    %177 = vector.broadcast %176 : vector<1x128xf32> to vector<16x128xf32>
    %178 = arith.addf %175, %177 : vector<16x128xf32>
    %cst_89 = arith.constant 0.000000e+00 : f32
    %179 = vector.broadcast %cst_89 : f32 to vector<16x128xf32>
    %180 = arith.maximumf %178, %179 : vector<16x128xf32>
    %c0_90 = arith.constant 0 : index
    %c0_91 = arith.constant 0 : index
    %181 = vector.load %arg14[%c0_90, %c0_91] : memref<128x128xf32, #tpu.memory_space<vmem>>, vector<128x128xf32>
    %cst_92 = arith.constant dense<0.000000e+00> : vector<16x128xf32>
    %182 = tpu.matmul %180, %181, %cst_92 {dimension_numbers = #tpu.dot_dimension_numbers<[1], [0], [0], [1], [0, 0, 1, 1], [], []>} : vector<16x128xf32>, vector<128x128xf32>, vector<16x128xf32> -> vector<16x128xf32>
    %c0_93 = arith.constant 0 : index
    %c0_94 = arith.constant 0 : index
    %183 = vector.load %arg15[%c0_93, %c0_94] : memref<1x128xf32, #tpu.memory_space<vmem>>, vector<1x128xf32>
    %184 = vector.broadcast %183 : vector<1x128xf32> to vector<16x128xf32>
    %185 = arith.addf %182, %184 : vector<16x128xf32>
    %c0_95 = arith.constant 0 : index
    %c0_96 = arith.constant 0 : index
    %186 = vector.load %arg16[%c0_95, %c0_96] : memref<16x128xf32, #tpu.memory_space<vmem>>, vector<16x128xf32>
    tpu.vector_store %arg16[%c0_95, %c0_96], %152 {strides = array<i32>} : memref<16x128xf32, #tpu.memory_space<vmem>>, vector<16x128xf32>,
    %c0_97 = arith.constant 0 : index
    %c0_98 = arith.constant 0 : index
    %187 = vector.load %arg17[%c0_97, %c0_98] : memref<16x128xf32, #tpu.memory_space<vmem>>, vector<16x128xf32>
    tpu.vector_store %arg17[%c0_97, %c0_98], %161 {strides = array<i32>} : memref<16x128xf32, #tpu.memory_space<vmem>>, vector<16x128xf32>,
    %188 = arith.mulf %173, %173 : vector<16x128xf32>
    %cst_99 = arith.constant dense<0.000000e+00> : vector<16xf32>
    %189 = vector.multi_reduction <add>, %188, %cst_99 [1] : vector<16x128xf32> to vector<16xf32>
    %190 = vector.shape_cast %189 : vector<16xf32> to vector<16x1xf32>
    %cst_100 = arith.constant 1.000000e-24 : f32
    %191 = vector.broadcast %cst_100 : f32 to vector<16x1xf32>
    %192 = arith.maximumf %190, %191 : vector<16x1xf32>
    %193 = math.rsqrt %192 : vector<16x1xf32>
    %194 = vector.broadcast %193 : vector<16x1xf32> to vector<16x128xf32>
    %195 = arith.mulf %173, %194 : vector<16x128xf32>
    %c0_101 = arith.constant 0 : index
    %c0_102 = arith.constant 0 : index
    %196 = vector.load %arg18[%c0_101, %c0_102] : memref<16x128xf32, #tpu.memory_space<vmem>>, vector<16x128xf32>
    tpu.vector_store %arg18[%c0_101, %c0_102], %195 {strides = array<i32>} : memref<16x128xf32, #tpu.memory_space<vmem>>, vector<16x128xf32>,
    %197 = arith.mulf %185, %185 : vector<16x128xf32>
    %cst_103 = arith.constant dense<0.000000e+00> : vector<16xf32>
    %198 = vector.multi_reduction <add>, %197, %cst_103 [1] : vector<16x128xf32> to vector<16xf32>
    %199 = vector.shape_cast %198 : vector<16xf32> to vector<16x1xf32>
    %cst_104 = arith.constant 1.000000e-24 : f32
    %200 = vector.broadcast %cst_104 : f32 to vector<16x1xf32>
    %201 = arith.maximumf %199, %200 : vector<16x1xf32>
    %202 = math.rsqrt %201 : vector<16x1xf32>
    %203 = vector.broadcast %202 : vector<16x1xf32> to vector<16x128xf32>
    %204 = arith.mulf %185, %203 : vector<16x128xf32>
    %c0_105 = arith.constant 0 : index
    %c0_106 = arith.constant 0 : index
    %205 = vector.load %arg19[%c0_105, %c0_106] : memref<16x128xf32, #tpu.memory_space<vmem>>, vector<16x128xf32>
    tpu.vector_store %arg19[%c0_105, %c0_106], %204 {strides = array<i32>} : memref<16x128xf32, #tpu.memory_space<vmem>>, vector<16x128xf32>,
    return
  }
}

</mosaic_0001>

<bundles_post_ra>
// kernel: cluster_gcn_forward.1
= control target key start
LH: loop header
LB: loop body
LE: loop exit
PB: predicated region body
PF: predicated region fallthrough
CT: control target
= control target key end

     0   :  { %s3483_s0 = inlined_call_operand.hbm [shape: f32[2,16,16], index: 0, kind: input, shape index: {}]   ;;  %s3484_s1 = inlined_call_operand.hbm [shape: f32[16,128], index: 1, kind: input, shape index: {}]   ;;  %s3485_s2 = inlined_call_operand.hbm [shape: f32[3,128,256], index: 2, kind: input, shape index: {}]   ;;  %s3486_s3 = inlined_call_operand.hbm [shape: f32[3,1,128], index: 3, kind: input, shape index: {}]   ;;  %s3487_s4 = inlined_call_operand.hbm [shape: f32[3,1,128], index: 4, kind: input, shape index: {}]   ;;  %s3488_s5 = inlined_call_operand.hbm [shape: f32[3,1,128], index: 5, kind: input, shape index: {}]   ;;  %s3489_s6 = inlined_call_operand.hbm [shape: f32[128,256], index: 6, kind: input, shape index: {}]   ;;  %s3490_s7 = inlined_call_operand.hbm [shape: f32[1,256], index: 7, kind: input, shape index: {}]   ;;  %s3491_s8 = inlined_call_operand.hbm [shape: f32[128,128], index: 8, kind: input, shape index: {}]   ;;  %s3492_s9 = inlined_call_operand.hbm [shape: f32[1,128], index: 9, kind: input, shape index: {}]   ;;  %s3493_s10 = inlined_call_operand.hbm [shape: f32[128,128], index: 10, kind: input, shape index: {}]   ;;  %s3494_s11 = inlined_call_operand.hbm [shape: f32[1,128], index: 11, kind: input, shape index: {}]   ;;  %s3495_s12 = inlined_call_operand.hbm [shape: f32[128,128], index: 12, kind: input, shape index: {}]   ;;  %s3496_s13 = inlined_call_operand.hbm [shape: f32[1,128], index: 13, kind: input, shape index: {}]   ;;  %s3497_s14 = inlined_call_operand.hbm [shape: f32[128,128], index: 14, kind: input, shape index: {}]   ;;  %s3498_s15 = inlined_call_operand.hbm [shape: f32[1,128], index: 15, kind: input, shape index: {}]   ;;  %s3499_s16 = inlined_call_operand.hbm [shape: f32[16,128], index: 16, kind: output, shape index: {0}]   ;;  %s3500_s17 = inlined_call_operand.hbm [shape: f32[16,128], index: 17, kind: output, shape index: {1}]   ;;  %s3501_s18 = inlined_call_operand.hbm [shape: f32[16,128], index: 18, kind: output, shape index: {2}]   ;;  %s3502_s19 = inlined_call_operand.hbm [shape: f32[16,128], index: 19, kind: output, shape index: {3}]  }
   0x1   :  { %3513 = sst [smem:[#allocation46_spill]] %s3483_s0 }
   0x2   :  { %3514 = sst [smem:[#allocation47_spill]] %s3484_s1 }
   0x3   :  { %3515 = sst [smem:[#allocation48_spill]] %s3485_s2 }
   0x4   :  { %3516 = sst [smem:[#allocation49_spill]] %s3486_s3 }
   0x5   :  { %3517 = sst [smem:[#allocation50_spill]] %s3501_s18 }
   0x6   :  { %3518 = sst [smem:[#allocation51_spill]] %s3502_s19 }
   0x7   :  { %25 = vsyncpa [#allocation3], 0 }
   0x8   :  { %26 = vsyncpa [#allocation6], 0 }
   0x9   :  { %27 = vsyncpa [#allocation9], 0 }
   0xa   :  { %28 = vsyncpa [#allocation12], 0 }
   0xb   :  { %29 = vsyncpa [#allocation15], 0 }
   0xc   :  { %30 = vsyncpa [#allocation18], 0 }
   0xd   :  { %31 = vsyncpa [#allocation21], 0 }
   0xe   :  { %32 = vsyncpa [#allocation24], 0 }
   0xf   :  { %33 = vsyncpa [#allocation27], 0 }
  0x10   :  { %34 = vsyncpa [#allocation4], 0 }
  0x11   :  { %35 = vsyncpa [#allocation30], 0 }
  0x12   :  { %36 = vsyncpa [#allocation33], 0  ;;  %s2998_s0 = smov [#allocation5]   ;;  %s2999_s20 = smov [#allocation8]  }
  0x13   :  { %s54_s30 = sshll.u32 %s2998_s0, 4  ;;  %s78_s21 = sshll.u32 %s2999_s20, 4  ;;  %s55_s30 = int_to_ptr.vmem [resolvable:$true] %s54_s30  ;;  %s79_s21 = int_to_ptr.vmem [resolvable:$true] %s78_s21 }
  0x14   :  { %s3519_s2 = sld [smem:[#allocation47_spill]] }
  0x1a   :  { %s2534_s23 = scalar_lea.hbm %s3519_s2, 256 }
  0x1b   :  { %p2535_p0 = scmp.ne.s32.totalorder %s3519_s2, %s2534_s23  ;;  %p2538_p1 = scmp.lt.u32.totalorder %s2534_s23, %s3519_s2 }
  0x1d   :  { %p2540_p2 = pnand %p2538_p1, %p2535_p0 }
  0x1f   :  { %2543 = shalt.err (!%p2540_p2)
}
  0x20   :  { %s2544_s27 = scalar_lea.vmem %s55_s30, 256  ;;  %p2549_p4 = scmp.lt.s32.totalorder %s55_s30, %s55_s30 }
  0x21   :  { %p2545_p3 = scmp.ne.s32.totalorder %s55_s30, %s2544_s27  ;;  %p2550_p5 = scmp.lt.s32.totalorder %s2544_s27, %s2544_s27 }
  0x23   :  { %p2551_p6 = por %p2550_p5, %p2549_p4 }
  0x25   :  { %p2552_p7 = pnand %p2551_p6, %p2545_p3 }
  0x27   :  { %2555 = shalt.err (!%p2552_p7)
}
  0x28   :  { %s3509_s28 = smov 128   ;;  %s3511_s29 = smov 8  }
  0x29   :  { %60 = dma.hbm_to_vmem [thread:$0]  %s3519_s2, 256, %s55_s30, [#allocation6], %s3509_s28, %s3509_s28, %s3511_s29  }
  0x2a   :  { %s3520_s23 = sld [smem:[#allocation49_spill]] }
  0x30   :  { %s2556_s24 = scalar_lea.hbm %s3520_s23, 48 }
  0x31   :  { %p2557_p8 = scmp.ne.s32.totalorder %s3520_s23, %s2556_s24  ;;  %p2560_p9 = scmp.lt.u32.totalorder %s2556_s24, %s3520_s23 }
  0x33   :  { %p2562_p10 = pnand %p2560_p9, %p2557_p8 }
  0x35   :  { %2565 = shalt.err (!%p2562_p10)
}
  0x36   :  { %s2566_s19 = scalar_lea.vmem %s79_s21, 48  ;;  %s2570_s18 = scalar_lea.vmem %s79_s21, 64 }
  0x37   :  { %p2567_p11 = scmp.ne.s32.totalorder %s79_s21, %s2566_s19  ;;  %p2571_p12 = scmp.lt.s32.totalorder %s79_s21, %s79_s21 }
  0x38   :  { %p2572_p13 = scmp.lt.s32.totalorder %s2570_s18, %s2566_s19 }
  0x3a   :  { %p2573_p0 = por %p2572_p13, %p2571_p12 }
  0x3c   :  { %p2574_p1 = pnand %p2573_p0, %p2567_p11 }
  0x3e   :  { %2577 = shalt.err (!%p2574_p1)
}
  0x3f   :  { %s3002_s30 = smov 16   ;;  %s3003_s2 = smov 1  }
  0x40   :  { %84 = dma.hbm_to_vmem [thread:$0]  %s3520_s23, 48, %s79_s21, [#allocation9], %s3002_s30, %s3002_s30, %s3003_s2  }
  0x41   :  { %s3004_s1 = smov [#allocation11]   ;;  %s3005_s24 = smov [#allocation14]  }
  0x42   :  { %s102_s22 = sshll.u32 %s3004_s1, 4  ;;  %s127_s25 = sshll.u32 %s3005_s24, 4  ;;  %s103_s22 = int_to_ptr.vmem [resolvable:$true] %s102_s22  ;;  %s128_s25 = int_to_ptr.vmem [resolvable:$true] %s127_s25 }
  0x43   :  { %s2578_s19 = scalar_lea.hbm %s3488_s5, 48 }
  0x44   :  { %p2579_p2 = scmp.ne.s32.totalorder %s3488_s5, %s2578_s19  ;;  %p2582_p3 = scmp.lt.u32.totalorder %s2578_s19, %s3488_s5 }
  0x46   :  { %p2584_p4 = pnand %p2582_p3, %p2579_p2 }
  0x48   :  { %2587 = shalt.err (!%p2584_p4)
}
  0x49   :  { %s2588_s21 = scalar_lea.vmem %s103_s22, 48  ;;  %s2592_s23 = scalar_lea.vmem %s103_s22, 64 }
  0x4a   :  { %p2589_p5 = scmp.ne.s32.totalorder %s103_s22, %s2588_s21  ;;  %p2593_p6 = scmp.lt.s32.totalorder %s103_s22, %s103_s22 }
  0x4b   :  { %p2594_p7 = scmp.lt.s32.totalorder %s2592_s23, %s2588_s21 }
  0x4d   :  { %p2595_p8 = por %p2594_p7, %p2593_p6 }
  0x4f   :  { %p2596_p9 = pnand %p2595_p8, %p2589_p5 }
  0x51   :  { %2599 = shalt.err (!%p2596_p9)
}
  0x52   :  { %108 = dma.hbm_to_vmem [thread:$0]  %s3488_s5, 48, %s103_s22, [#allocation12], %s3002_s30, %s3002_s30, %s3003_s2  }
  0x53   :  { %s2600_s29 = scalar_lea.hbm %s3490_s7, 32 }
  0x54   :  { %p2601_p10 = scmp.ne.s32.totalorder %s3490_s7, %s2600_s29  ;;  %p2604_p11 = scmp.lt.u32.totalorder %s2600_s29, %s3490_s7 }
  0x56   :  { %p2606_p12 = pnand %p2604_p11, %p2601_p10 }
  0x58   :  { %2609 = shalt.err (!%p2606_p12)
}
  0x59   :  { %s2610_s26 = scalar_lea.vmem %s128_s25, 32  ;;  %p2615_p0 = scmp.lt.s32.totalorder %s128_s25, %s128_s25 }
  0x5a   :  { %p2611_p13 = scmp.ne.s32.totalorder %s128_s25, %s2610_s26  ;;  %p2616_p1 = scmp.lt.s32.totalorder %s2610_s26, %s2610_s26 }
  0x5c   :  { %p2617_p2 = por %p2616_p1, %p2615_p0 }
  0x5e   :  { %p2618_p3 = pnand %p2617_p2, %p2611_p13 }
  0x60   :  { %2621 = shalt.err (!%p2618_p3)
}
  0x61   :  { %130 = dma.hbm_to_vmem [thread:$0]  %s3490_s7, 32, %s128_s25, [#allocation15]  }
  0x62   :  { %s3006_s27 = smov [#allocation17]   ;;  %s3007_s23 = smov [#allocation20]  }
  0x63   :  { %s149_s21 = sshll.u32 %s3006_s27, 4  ;;  %s171_s0 = sshll.u32 %s3007_s23, 4  ;;  %s150_s21 = int_to_ptr.vmem [resolvable:$true] %s149_s21  ;;  %s172_s0 = int_to_ptr.vmem [resolvable:$true] %s171_s0 }
  0x64   :  { %s2622_s28 = scalar_lea.hbm %s3492_s9, 16 }
  0x65   :  { %p2623_p4 = scmp.ne.s32.totalorder %s3492_s9, %s2622_s28  ;;  %p2626_p5 = scmp.lt.u32.totalorder %s2622_s28, %s3492_s9 }
  0x67   :  { %p2628_p6 = pnand %p2626_p5, %p2623_p4 }
  0x69   :  { %2631 = shalt.err (!%p2628_p6)
}
  0x6a   :  { %s2632_s7 = scalar_lea.vmem %s150_s21, 16  ;;  %s2636_s25 = scalar_lea.vmem %s150_s21, 32 }
  0x6b   :  { %p2633_p7 = scmp.ne.s32.totalorder %s150_s21, %s2632_s7  ;;  %p2637_p8 = scmp.lt.s32.totalorder %s150_s21, %s150_s21 }
  0x6c   :  { %p2638_p9 = scmp.lt.s32.totalorder %s2636_s25, %s2632_s7 }
  0x6e   :  { %p2639_p10 = por %p2638_p9, %p2637_p8 }
  0x70   :  { %p2640_p11 = pnand %p2639_p10, %p2633_p7 }
  0x72   :  { %2643 = shalt.err (!%p2640_p11)
}
  0x73   :  { %152 = dma.hbm_to_vmem [thread:$0]  %s3492_s9, 16, %s150_s21, [#allocation18]  }
  0x74   :  { %s2644_s27 = scalar_lea.hbm %s3494_s11, 16 }
  0x75   :  { %p2645_p12 = scmp.ne.s32.totalorder %s3494_s11, %s2644_s27  ;;  %p2648_p13 = scmp.lt.u32.totalorder %s2644_s27, %s3494_s11 }
  0x77   :  { %p2650_p0 = pnand %p2648_p13, %p2645_p12 }
  0x79   :  { %2653 = shalt.err (!%p2650_p0)
}
  0x7a   :  { %s2654_s29 = scalar_lea.vmem %s172_s0, 16  ;;  %s2658_s24 = scalar_lea.vmem %s172_s0, 32 }
  0x7b   :  { %p2655_p1 = scmp.ne.s32.totalorder %s172_s0, %s2654_s29  ;;  %p2659_p2 = scmp.lt.s32.totalorder %s172_s0, %s172_s0 }
  0x7c   :  { %p2660_p3 = scmp.lt.s32.totalorder %s2658_s24, %s2654_s29 }
  0x7e   :  { %p2661_p4 = por %p2660_p3, %p2659_p2 }
  0x80   :  { %p2662_p5 = pnand %p2661_p4, %p2655_p1 }
  0x82   :  { %2665 = shalt.err (!%p2662_p5)
}
  0x83   :  { %174 = dma.hbm_to_vmem [thread:$0]  %s3494_s11, 16, %s172_s0, [#allocation21]  }
  0x84   :  { %s3008_s3 = smov [#allocation23]   ;;  %s3009_s7 = smov [#allocation2]  }
  0x85   :  { %s193_s18 = sshll.u32 %s3008_s3, 4  ;;  %s42_s25 = sshll.u32 %s3009_s7, 4  ;;  %s194_s18 = int_to_ptr.vmem [resolvable:$true] %s193_s18  ;;  %s3205_s25 = int_to_ptr.vmem [resolvable:$true] %s42_s25 }
  0x86   :  { %s2666_s5 = scalar_lea.hbm %s3496_s13, 16 }
  0x87   :  { %p2667_p6 = scmp.ne.s32.totalorder %s3496_s13, %s2666_s5  ;;  %p2670_p7 = scmp.lt.u32.totalorder %s2666_s5, %s3496_s13 }
  0x89   :  { %p2672_p8 = pnand %p2670_p7, %p2667_p6 }
  0x8b   :  { %2675 = shalt.err (!%p2672_p8)
}
  0x8c   :  { %s2676_s11 = scalar_lea.vmem %s194_s18, 16  ;;  %s2680_s0 = scalar_lea.vmem %s194_s18, 32 }
  0x8d   :  { %p2677_p9 = scmp.ne.s32.totalorder %s194_s18, %s2676_s11  ;;  %p2681_p10 = scmp.lt.s32.totalorder %s194_s18, %s194_s18 }
  0x8e   :  { %p2682_p11 = scmp.lt.s32.totalorder %s2680_s0, %s2676_s11 }
  0x90   :  { %p2683_p12 = por %p2682_p11, %p2681_p10 }
  0x92   :  { %p2684_p13 = pnand %p2683_p12, %p2677_p9 }
  0x94   :  { %2687 = shalt.err (!%p2684_p13)
}
  0x95   :  { %196 = dma.hbm_to_vmem [thread:$0]  %s3496_s13, 16, %s194_s18, [#allocation24]  }
  0x96   :  { %s3521_s9 = sld [smem:[#allocation46_spill]] }
  0x9c   :  { %s2688_s21 = scalar_lea.hbm %s3521_s9, 512 }
  0x9d   :  { %p2689_p0 = scmp.ne.s32.totalorder %s3521_s9, %s2688_s21  ;;  %p2692_p1 = scmp.lt.u32.totalorder %s2688_s21, %s3521_s9 }
  0x9f   :  { %p2694_p2 = pnand %p2692_p1, %p2689_p0 }
  0xa1   :  { %2697 = shalt.err (!%p2694_p2)
}
  0xa2   :  { %s2698_s5 = scalar_lea.vmem %s3205_s25, 512  ;;  %p2703_p4 = scmp.lt.s32.totalorder %s3205_s25, %s3205_s25 }
  0xa3   :  { %p2699_p3 = scmp.ne.s32.totalorder %s3205_s25, %s2698_s5  ;;  %p2704_p5 = scmp.lt.s32.totalorder %s2698_s5, %s2698_s5 }
  0xa5   :  { %p2705_p6 = por %p2704_p5, %p2703_p4 }
  0xa7   :  { %p2706_p7 = pnand %p2705_p6, %p2699_p3 }
  0xa9   :  { %2709 = shalt.err (!%p2706_p7)
}
  0xaa   :  { %s3522_s13 = smov 8   ;;  %s3523_s18 = smov 128  }
  0xab   :  { %48 = dma.hbm_to_vmem [thread:$0]  %s3521_s9, 512, %s3205_s25, [#allocation3], %s3523_s18, %s3523_s18, %s3522_s13  }
  0xac   :  { %s3010_s23 = smov [#allocation7]   ;;  %s3011_s11 = smov [#allocation10]  }
  0xad   :  { %s66_s20 = sshll.u32 %s3010_s23, 4  ;;  %s90_s0 = sshll.u32 %s3011_s11, 4  ;;  %s67_s20 = int_to_ptr.vmem [resolvable:$true] %s66_s20  ;;  %s91_s0 = int_to_ptr.vmem [resolvable:$true] %s90_s0 }
  0xae   :  { %s3524_s29 = sld [smem:[#allocation48_spill]] }
  0xb4   :  { %s2710_s24 = scalar_lea.hbm %s3524_s29, 12288 }
  0xb5   :  { %p2711_p8 = scmp.ne.s32.totalorder %s3524_s29, %s2710_s24  ;;  %p2714_p9 = scmp.lt.u32.totalorder %s2710_s24, %s3524_s29 }
  0xb7   :  { %p2716_p10 = pnand %p2714_p9, %p2711_p8 }
  0xb9   :  { %2719 = shalt.err (!%p2716_p10)
}
  0xba   :  { %s2720_s25 = scalar_lea.vmem %s67_s20, 12288  ;;  %p2725_p12 = scmp.lt.s32.totalorder %s67_s20, %s67_s20 }
  0xbb   :  { %p2721_p11 = scmp.ne.s32.totalorder %s67_s20, %s2720_s25  ;;  %p2726_p13 = scmp.lt.s32.totalorder %s2720_s25, %s2720_s25 }
  0xbd   :  { %p2727_p0 = por %p2726_p13, %p2725_p12 }
  0xbf   :  { %p2728_p1 = pnand %p2727_p0, %p2721_p11 }
  0xc1   :  { %2731 = shalt.err (!%p2728_p1)
}
  0xc2   :  { %s3012_s9 = smov 256   ;;  %s2732_s23 = scalar_lea.hbm %s3487_s4, 48 }
  0xc3   :  { %72 = dma.hbm_to_vmem [thread:$0]  %s3524_s29, 12288, %s67_s20, [#allocation6], %s3012_s9, %s3012_s9, %s3002_s30  }
  0xc4   :  { %p2733_p2 = scmp.ne.s32.totalorder %s3487_s4, %s2732_s23  ;;  %p2736_p3 = scmp.lt.u32.totalorder %s2732_s23, %s3487_s4 }
  0xc6   :  { %p2738_p4 = pnand %p2736_p3, %p2733_p2 }
  0xc8   :  { %2741 = shalt.err (!%p2738_p4)
}
  0xc9   :  { %s2742_s21 = scalar_lea.vmem %s91_s0, 48  ;;  %s2746_s3 = scalar_lea.vmem %s91_s0, 64 }
  0xca   :  { %p2743_p5 = scmp.ne.s32.totalorder %s91_s0, %s2742_s21  ;;  %p2747_p6 = scmp.lt.s32.totalorder %s91_s0, %s91_s0 }
  0xcb   :  { %p2748_p7 = scmp.lt.s32.totalorder %s2746_s3, %s2742_s21 }
  0xcd   :  { %p2749_p8 = por %p2748_p7, %p2747_p6 }
  0xcf   :  { %p2750_p9 = pnand %p2749_p8, %p2743_p5 }
  0xd1   :  { %2753 = shalt.err (!%p2750_p9)
}
  0xd2   :  { %96 = dma.hbm_to_vmem [thread:$0]  %s3487_s4, 48, %s91_s0, [#allocation9], %s3002_s30, %s3002_s30, %s3003_s2  }
  0xd3   :  { %s3013_s7 = smov [#allocation13]   ;;  %s3014_s25 = smov [#allocation16]  }
  0xd4   :  { %s114_s19 = sshll.u32 %s3013_s7, 4  ;;  %s136_s26 = sshll.u32 %s3014_s25, 4  ;;  %s115_s19 = int_to_ptr.vmem [resolvable:$true] %s114_s19  ;;  %s137_s26 = int_to_ptr.vmem [resolvable:$true] %s136_s26 }
  0xd5   :  { %s2754_s27 = scalar_lea.hbm %s3489_s6, 4096 }
  0xd6   :  { %p2755_p10 = scmp.ne.s32.totalorder %s3489_s6, %s2754_s27  ;;  %p2758_p11 = scmp.lt.u32.totalorder %s2754_s27, %s3489_s6 }
  0xd8   :  { %p2760_p12 = pnand %p2758_p11, %p2755_p10 }
  0xda   :  { %2763 = shalt.err (!%p2760_p12)
}
  0xdb   :  { %s2764_s4 = scalar_lea.vmem %s115_s19, 4096  ;;  %p2769_p0 = scmp.lt.s32.totalorder %s115_s19, %s115_s19 }
  0xdc   :  { %p2765_p13 = scmp.ne.s32.totalorder %s115_s19, %s2764_s4  ;;  %p2770_p1 = scmp.lt.s32.totalorder %s2764_s4, %s2764_s4 }
  0xde   :  { %p2771_p2 = por %p2770_p1, %p2769_p0 }
  0xe0   :  { %p2772_p3 = pnand %p2771_p2, %p2765_p13 }
  0xe2   :  { %2775 = shalt.err (!%p2772_p3)
}
  0xe3   :  { %120 = dma.hbm_to_vmem [thread:$0]  %s3489_s6, 4096, %s115_s19, [#allocation12], %s3012_s9, %s3012_s9, %s3002_s30  }
  0xe4   :  { %s2776_s3 = scalar_lea.hbm %s3491_s8, 2048 }
  0xe5   :  { %p2777_p4 = scmp.ne.s32.totalorder %s3491_s8, %s2776_s3  ;;  %p2780_p5 = scmp.lt.u32.totalorder %s2776_s3, %s3491_s8 }
  0xe7   :  { %p2782_p6 = pnand %p2780_p5, %p2777_p4 }
  0xe9   :  { %2785 = shalt.err (!%p2782_p6)
}
  0xea   :  { %s2786_s5 = scalar_lea.vmem %s137_s26, 2048  ;;  %p2791_p8 = scmp.lt.s32.totalorder %s137_s26, %s137_s26 }
  0xeb   :  { %p2787_p7 = scmp.ne.s32.totalorder %s137_s26, %s2786_s5  ;;  %p2792_p9 = scmp.lt.s32.totalorder %s2786_s5, %s2786_s5 }
  0xed   :  { %p2793_p10 = por %p2792_p9, %p2791_p8 }
  0xef   :  { %p2794_p11 = pnand %p2793_p10, %p2787_p7 }
  0xf1   :  { %2797 = shalt.err (!%p2794_p11)
}
  0xf2   :  { %142 = dma.hbm_to_vmem [thread:$0]  %s3491_s8, 2048, %s137_s26, [#allocation15], %s3523_s18, %s3523_s18, %s3522_s13  }
  0xf3   :  { %s3015_s9 = smov [#allocation19]   ;;  %s3016_s22 = smov [#allocation22]  }
  0xf4   :  { %s158_s19 = sshll.u32 %s3015_s9, 4  ;;  %s180_s27 = sshll.u32 %s3016_s22, 4  ;;  %s159_s19 = int_to_ptr.vmem [resolvable:$true] %s158_s19  ;;  %s181_s27 = int_to_ptr.vmem [resolvable:$true] %s180_s27 }
  0xf5   :  { %s2798_s1 = scalar_lea.hbm %s3493_s10, 2048 }
  0xf6   :  { %p2799_p12 = scmp.ne.s32.totalorder %s3493_s10, %s2798_s1  ;;  %p2802_p13 = scmp.lt.u32.totalorder %s2798_s1, %s3493_s10 }
  0xf8   :  { %p2804_p0 = pnand %p2802_p13, %p2799_p12 }
  0xfa   :  { %2807 = shalt.err (!%p2804_p0)
}
  0xfb   :  { %s2808_s8 = scalar_lea.vmem %s159_s19, 2048  ;;  %p2813_p2 = scmp.lt.s32.totalorder %s159_s19, %s159_s19 }
  0xfc   :  { %p2809_p1 = scmp.ne.s32.totalorder %s159_s19, %s2808_s8  ;;  %p2814_p3 = scmp.lt.s32.totalorder %s2808_s8, %s2808_s8 }
  0xfe   :  { %p2815_p4 = por %p2814_p3, %p2813_p2 }
 0x100   :  { %p2816_p5 = pnand %p2815_p4, %p2809_p1 }
 0x102   :  { %2819 = shalt.err (!%p2816_p5)
}
 0x103   :  { %164 = dma.hbm_to_vmem [thread:$0]  %s3493_s10, 2048, %s159_s19, [#allocation18], %s3523_s18, %s3523_s18, %s3522_s13  }
 0x104   :  { %s2820_s20 = scalar_lea.hbm %s3495_s12, 2048 }
 0x105   :  { %p2821_p6 = scmp.ne.s32.totalorder %s3495_s12, %s2820_s20  ;;  %p2824_p7 = scmp.lt.u32.totalorder %s2820_s20, %s3495_s12 }
 0x107   :  { %p2826_p8 = pnand %p2824_p7, %p2821_p6 }
 0x109   :  { %2829 = shalt.err (!%p2826_p8)
}
 0x10a   :  { %s2830_s6 = scalar_lea.vmem %s181_s27, 2048  ;;  %p2835_p10 = scmp.lt.s32.totalorder %s181_s27, %s181_s27 }
 0x10b   :  { %p2831_p9 = scmp.ne.s32.totalorder %s181_s27, %s2830_s6  ;;  %p2836_p11 = scmp.lt.s32.totalorder %s2830_s6, %s2830_s6 }
 0x10d   :  { %p2837_p12 = por %p2836_p11, %p2835_p10 }
 0x10f   :  { %p2838_p13 = pnand %p2837_p12, %p2831_p9 }
 0x111   :  { %2841 = shalt.err (!%p2838_p13)
}
 0x112   :  { %186 = dma.hbm_to_vmem [thread:$0]  %s3495_s12, 2048, %s181_s27, [#allocation21], %s3523_s18, %s3523_s18, %s3522_s13  }
 0x113   :  { %s3017_s9 = smov [#allocation25]   ;;  %s3018_s22 = smov [#allocation26]  }
 0x114   :  { %s202_s19 = sshll.u32 %s3017_s9, 4  ;;  %s215_s23 = sshll.u32 %s3018_s22, 4  ;;  %s203_s19 = int_to_ptr.vmem [resolvable:$true] %s202_s19  ;;  %s216_s23 = int_to_ptr.vmem [resolvable:$true] %s215_s23 }
 0x115   :  { %s2842_s28 = scalar_lea.hbm %s3497_s14, 2048 }
 0x116   :  { %p2843_p0 = scmp.ne.s32.totalorder %s3497_s14, %s2842_s28  ;;  %p2846_p1 = scmp.lt.u32.totalorder %s2842_s28, %s3497_s14 }
 0x118   :  { %p2848_p2 = pnand %p2846_p1, %p2843_p0 }
 0x11a   :  { %2851 = shalt.err (!%p2848_p2)
}
 0x11b   :  { %s2852_s12 = scalar_lea.vmem %s203_s19, 2048  ;;  %p2857_p4 = scmp.lt.s32.totalorder %s203_s19, %s203_s19 }
 0x11c   :  { %p2853_p3 = scmp.ne.s32.totalorder %s203_s19, %s2852_s12  ;;  %p2858_p5 = scmp.lt.s32.totalorder %s2852_s12, %s2852_s12 }
 0x11e   :  { %p2859_p6 = por %p2858_p5, %p2857_p4 }
 0x120   :  { %p2860_p7 = pnand %p2859_p6, %p2853_p3 }
 0x122   :  { %2863 = shalt.err (!%p2860_p7)
}
 0x123   :  { %208 = dma.hbm_to_vmem [thread:$0]  %s3497_s14, 2048, %s203_s19, [#allocation24], %s3523_s18, %s3523_s18, %s3522_s13  }
 0x124   :  { %s2864_s3 = scalar_lea.hbm %s3498_s15, 16 }
 0x125   :  { %p2865_p8 = scmp.ne.s32.totalorder %s3498_s15, %s2864_s3  ;;  %p2868_p9 = scmp.lt.u32.totalorder %s2864_s3, %s3498_s15 }
 0x127   :  { %p2870_p10 = pnand %p2868_p9, %p2865_p8 }
 0x129   :  { %2873 = shalt.err (!%p2870_p10)
}
 0x12a   :  { %s2874_s5 = scalar_lea.vmem %s216_s23, 16  ;;  %s2878_s6 = scalar_lea.vmem %s216_s23, 32 }
 0x12b   :  { %p2875_p11 = scmp.ne.s32.totalorder %s216_s23, %s2874_s5  ;;  %p2879_p12 = scmp.lt.s32.totalorder %s216_s23, %s216_s23 }
 0x12c   :  { %p2880_p13 = scmp.lt.s32.totalorder %s2878_s6, %s2874_s5 }
 0x12e   :  { %p2881_p0 = por %p2880_p13, %p2879_p12 }
 0x130   :  { %p2882_p1 = pnand %p2881_p0, %p2875_p11 }
 0x132   :  { %2885 = shalt.err (!%p2882_p1)
}
 0x133   :  { %218 = dma.hbm_to_vmem [thread:$0]  %s3498_s15, 16, %s216_s23, [#allocation27]  }
 0x134   :  { %2974 = dma.done.wait [#allocation3], 512  }
 0x135   :  { %2975 = vsyncadd [#allocation3], 4294966784 }
 0x136   :  { %2976 = dma.done.wait [#allocation6], 12544  }
 0x137   :  { %2977 = vsyncadd [#allocation6], 4294954752 }
 0x138   :  { %2978 = dma.done.wait [#allocation9], 96  }
 0x139   :  { %2979 = vsyncadd [#allocation9], 4294967200 }
 0x13a   :  { %2980 = dma.done.wait [#allocation12], 4144  }
 0x13b   :  { %2981 = vsyncadd [#allocation12], 4294963152 }
 0x13c   :  { %2982 = dma.done.wait [#allocation15], 2080  }
 0x13d   :  { %2983 = vsyncadd [#allocation15], 4294965216 }
 0x13e   :  { %2984 = dma.done.wait [#allocation18], 2064  }
 0x13f   :  { %2985 = vsyncadd [#allocation18], 4294965232 }
 0x140   :  { %2986 = dma.done.wait [#allocation21], 2064  }
 0x141   :  { %2987 = vsyncadd [#allocation21], 4294965232 }
 0x142   :  { %2988 = dma.done.wait [#allocation24], 2064  }
 0x143   :  { %2989 = vsyncadd [#allocation24], 4294965232 }
 0x144   :  { %2990 = dma.done.wait [#allocation27], 16  }
 0x145   :  { %2991 = vsyncadd [#allocation27], 4294967280  ;;  %v3019_v0 = vmov 0.0   ;;  %v284_v1 = vld [vmem:[#allocation7 + $0x8] sm:$0xff]  ;;  %v286_v2 = vld [vmem:[#allocation7 + $0x18] sm:$0xff]  ;;  %vm392_vm0 = vcmask 130048  }
 0x146   :  { %379 = vmatprep.mubr.f32.mxu0 %v3019_v0  ;;  %v283_v3 = vld [vmem:[#allocation7] sm:$0xff]  ;;  %v2196_v4 = vpack.c.bf16 %v286_v2, %v284_v1  ;;  %v285_v5 = vld [vmem:[#allocation7 + $0x10] sm:$0xff]  ;;  %v288_v6 = vld [vmem:[#allocation7 + $0x28] sm:$0xff]  ;;  %s3020_s15 = smov [#allocation29]   ;;  %s3021_s9 = smov [#allocation28]  }
 0x147   :  { %v290_v7 = vld [vmem:[#allocation7 + $0x38] sm:$0xff]  ;;  %v2198_v8 = vpack.c.bf16 %v285_v5, %v283_v3  ;;  %v287_v10 = vld [vmem:[#allocation7 + $0x20] sm:$0xff]  ;;  %v289_v11 = vld [vmem:[#allocation7 + $0x30] sm:$0xff]  ;;  %s1838_s30 = sshll.u32 %s3020_s15, 4  ;;  %s1826_s19 = sshll.u32 %s3021_s9, 4  ;;  %s1839_s30 = int_to_ptr.vmem [resolvable:$true] %s1838_s30  ;;  %s3414_s19 = int_to_ptr.vmem [resolvable:$true] %s1826_s19 }
 0x148   :  { %v2200_v9 = vpack.c.bf16 %v290_v7, %v288_v6  ;;  %v292_v12 = vld [vmem:[#allocation7 + $0x48] sm:$0xff]  ;;  %2197 = vmatprep.subr.bf16.mxu0 %v2196_v4  ;;  %v294_v13 = vld [vmem:[#allocation7 + $0x58] sm:$0xff]  ;;  %v2202_v14 = vpack.c.bf16 %v289_v11, %v287_v10  ;;  %v291_v16 = vld [vmem:[#allocation7 + $0x40] sm:$0xff]  ;;  %s2886_s22 = scalar_lea.vmem %s1839_s30, 256  ;;  %p2891_p3 = scmp.lt.s32.totalorder %s1839_s30, %s1839_s30 }
 0x149   :  { %2199 = vmatpush1.bf16.msra.mxu0 %v2198_v8  ;;  %v2204_v15 = vpack.c.bf16 %v294_v13, %v292_v12  ;;  %v293_v17 = vld [vmem:[#allocation7 + $0x50] sm:$0xff]  ;;  %v296_v18 = vld [vmem:[#allocation7 + $0x68] sm:$0xff]  ;;  %v298_v19 = vld [vmem:[#allocation7 + $0x78] sm:$0xff]  ;;  %p2887_p2 = scmp.ne.s32.totalorder %s1839_s30, %s2886_s22  ;;  %p2892_p4 = scmp.lt.s32.totalorder %s2886_s22, %s2886_s22 }
 0x14a   :  { %2201 = vmatprep.subr.bf16.mxu0 %v2200_v9  ;;  %v2206_v20 = vpack.c.bf16 %v293_v17, %v291_v16  ;;  %v2208_v21 = vpack.c.bf16 %v298_v19, %v296_v18  ;;  %v295_v22 = vld [vmem:[#allocation7 + $0x60] sm:$0xff]  ;;  %v297_v23 = vld [vmem:[#allocation7 + $0x70] sm:$0xff]  ;;  %v300_v24 = vld [vmem:[#allocation7 + $0x88] sm:$0xff] }
 0x14b   :  { %v302_v25 = vld [vmem:[#allocation7 + $0x98] sm:$0xff]  ;;  %v2210_v26 = vpack.c.bf16 %v297_v23, %v295_v22  ;;  %v299_v28 = vld [vmem:[#allocation7 + $0x80] sm:$0xff]  ;;  %v301_v29 = vld [vmem:[#allocation7 + $0x90] sm:$0xff]  ;;  %p2893_p5 = por %p2892_p4, %p2891_p3 }
 0x14c   :  { %v2212_v27 = vpack.c.bf16 %v302_v25, %v300_v24  ;;  %v304_v30 = vld [vmem:[#allocation7 + $0xa8] sm:$0xff]  ;;  %v306_v31 = vld [vmem:[#allocation7 + $0xb8] sm:$0xff]  ;;  %v2214_v32 = vpack.c.bf16 %v301_v29, %v299_v28  ;;  %v303_v34 = vld [vmem:[#allocation7 + $0xa0] sm:$0xff] }
 0x14d   :  { %2203 = vmatpush1.bf16.msra.mxu0 %v2202_v14  ;;  %v2216_v33 = vpack.c.bf16 %v306_v31, %v304_v30  ;;  %v305_v35 = vld [vmem:[#allocation7 + $0xb0] sm:$0xff]  ;;  %v308_v36 = vld [vmem:[#allocation7 + $0xc8] sm:$0xff]  ;;  %v310_v37 = vld [vmem:[#allocation7 + $0xd8] sm:$0xff]  ;;  %p2894_p6 = pnand %p2893_p5, %p2887_p2 }
 0x14e   :  { %2205 = vmatprep.subr.bf16.mxu0 %v2204_v15  ;;  %v2218_v38 = vpack.c.bf16 %v305_v35, %v303_v34  ;;  %v2220_v39 = vpack.c.bf16 %v310_v37, %v308_v36  ;;  %v307_v40 = vld [vmem:[#allocation7 + $0xc0] sm:$0xff]  ;;  %v309_v41 = vld [vmem:[#allocation7 + $0xd0] sm:$0xff]  ;;  %v312_v42 = vld [vmem:[#allocation7 + $0xe8] sm:$0xff] }
 0x14f   :  { %v314_v43 = vld [vmem:[#allocation7 + $0xf8] sm:$0xff]  ;;  %v2222_v44 = vpack.c.bf16 %v309_v41, %v307_v40  ;;  %v311_v46 = vld [vmem:[#allocation7 + $0xe0] sm:$0xff]  ;;  %v313_v47 = vld [vmem:[#allocation7 + $0xf0] sm:$0xff] }
 0x150   :  { %v2224_v45 = vpack.c.bf16 %v314_v43, %v312_v42  ;;  %v2226_v48 = vpack.c.bf16 %v313_v47, %v311_v46  ;;  %v281_v49 = vld [vmem:[#allocation5] sm:$0xff]  ;;  %v282_v50 = vld [vmem:[#allocation5 + $0x8] sm:$0xff]  ;;  %v3358_v51 = vld [vmem:[#allocation2 + $0x10] sm:$0xff] }
 0x151   :  { %2207 = vmatpush1.bf16.msra.mxu0 %v2206_v20  ;;  %2018 = vmatprep.mubr.msk.f32.mxu1 %vm392_vm0, %v3358_v51  ;;  %v3362_v52 = vld [vmem:[#allocation2] sm:$0xff]  ;;  %v3366_v59 = vld [vmem:[#allocation2 + $0x18] sm:$0xff]  ;;  %v3372_v60 = vld [vmem:[#allocation2 + $0x8] sm:$0xff] }
 0x152   :  { %2209 = vmatprep.subr.bf16.mxu0 %v2208_v21  ;;  %v616_v61 = vld [vmem:[#allocation7 + $0x108] sm:$0xff]  ;;  %v618_v62 = vld [vmem:[#allocation7 + $0x118] sm:$0xff]  ;;  %v615_v1 = vld [vmem:[#allocation7 + $0x100] sm:$0xff] }
 0x153   :  { %v2236_v63 = vpack.c.bf16 %v618_v62, %v616_v61  ;;  %v617_v2 = vld [vmem:[#allocation7 + $0x110] sm:$0xff]  ;;  %v620_v4 = vld [vmem:[#allocation7 + $0x128] sm:$0xff]  ;;  %v622_v5 = vld [vmem:[#allocation7 + $0x138] sm:$0xff] }
 0x154   :  { %v2238_v3 = vpack.c.bf16 %v617_v2, %v615_v1  ;;  %v2240_v6 = vpack.c.bf16 %v622_v5, %v620_v4  ;;  %v619_v7 = vld [vmem:[#allocation7 + $0x120] sm:$0xff]  ;;  %v621_v8 = vld [vmem:[#allocation7 + $0x130] sm:$0xff]  ;;  %v624_v10 = vld [vmem:[#allocation7 + $0x148] sm:$0xff] }
 0x155   :  { %2211 = vmatpush1.bf16.msra.mxu0 %v2210_v26  ;;  %v2242_v9 = vpack.c.bf16 %v621_v8, %v619_v7  ;;  %v626_v11 = vld [vmem:[#allocation7 + $0x158] sm:$0xff]  ;;  %v623_v13 = vld [vmem:[#allocation7 + $0x140] sm:$0xff]  ;;  %v625_v14 = vld [vmem:[#allocation7 + $0x150] sm:$0xff] }
 0x156   :  { %2213 = vmatprep.subr.bf16.mxu0 %v2212_v27  ;;  %v2244_v12 = vpack.c.bf16 %v626_v11, %v624_v10  ;;  %v2246_v15 = vpack.c.bf16 %v625_v14, %v623_v13  ;;  %v628_v16 = vld [vmem:[#allocation7 + $0x168] sm:$0xff]  ;;  %v630_v17 = vld [vmem:[#allocation7 + $0x178] sm:$0xff]  ;;  %v627_v19 = vld [vmem:[#allocation7 + $0x160] sm:$0xff] }
 0x157   :  { %v2248_v18 = vpack.c.bf16 %v630_v17, %v628_v16  ;;  %v629_v20 = vld [vmem:[#allocation7 + $0x170] sm:$0xff]  ;;  %v632_v22 = vld [vmem:[#allocation7 + $0x188] sm:$0xff]  ;;  %v634_v23 = vld [vmem:[#allocation7 + $0x198] sm:$0xff] }
 0x158   :  { %v2250_v21 = vpack.c.bf16 %v629_v20, %v627_v19  ;;  %v2252_v24 = vpack.c.bf16 %v634_v23, %v632_v22  ;;  %v631_v25 = vld [vmem:[#allocation7 + $0x180] sm:$0xff]  ;;  %v633_v26 = vld [vmem:[#allocation7 + $0x190] sm:$0xff]  ;;  %v636_v28 = vld [vmem:[#allocation7 + $0x1a8] sm:$0xff] }
 0x159   :  { %2215 = vmatpush1.bf16.msra.mxu0 %v2214_v32  ;;  %v2254_v27 = vpack.c.bf16 %v633_v26, %v631_v25  ;;  %v638_v29 = vld [vmem:[#allocation7 + $0x1b8] sm:$0xff]  ;;  %v635_v31 = vld [vmem:[#allocation7 + $0x1a0] sm:$0xff]  ;;  %v637_v32 = vld [vmem:[#allocation7 + $0x1b0] sm:$0xff] }
 0x15a   :  { %2217 = vmatprep.subr.bf16.mxu0 %v2216_v33  ;;  %v2256_v30 = vpack.c.bf16 %v638_v29, %v636_v28  ;;  %v2258_v33 = vpack.c.bf16 %v637_v32, %v635_v31  ;;  %v640_v34 = vld [vmem:[#allocation7 + $0x1c8] sm:$0xff]  ;;  %v642_v35 = vld [vmem:[#allocation7 + $0x1d8] sm:$0xff]  ;;  %v639_v37 = vld [vmem:[#allocation7 + $0x1c0] sm:$0xff] }
 0x15b   :  { %v2260_v36 = vpack.c.bf16 %v642_v35, %v640_v34  ;;  %v644_v40 = vld [vmem:[#allocation7 + $0x1e8] sm:$0xff]  ;;  %v646_v41 = vld [vmem:[#allocation7 + $0x1f8] sm:$0xff]  ;;  %v643_v43 = vld [vmem:[#allocation7 + $0x1e0] sm:$0xff] }
 0x15c   :  { %v2264_v42 = vpack.c.bf16 %v646_v41, %v644_v40  ;;  %v1897_v46 = vld [vmem:[#allocation8] ss:$0 sm:$0xff]  ;;  %v1898_v14 = vld [vmem:[#allocation10] ss:$0 sm:$0xff]  ;;  %v1899_v17 = vld [vmem:[#allocation11] ss:$0 sm:$0xff] }
 0x15d   :  { %2219 = vmatpush1.bf16.msra.mxu0 %v2218_v38  ;;  %v641_v38 = vld [vmem:[#allocation7 + $0x1d0] sm:$0xff]  ;;  %v940_v31 = vld [vmem:[#allocation7 + $0x218] sm:$0xff] }
 0x15e   :  { %2221 = vmatprep.subr.bf16.mxu0 %v2220_v39  ;;  %v2262_v39 = vpack.c.bf16 %v641_v38, %v639_v37  ;;  %v939_v34 = vld [vmem:[#allocation7 + $0x210] sm:$0xff]  ;;  %v944_v37 = vld [vmem:[#allocation7 + $0x238] sm:$0xff] }
 0x15f   :  { %v943_v40 = vld [vmem:[#allocation7 + $0x230] sm:$0xff] }
 0x161   :  { %2223 = vmatpush1.bf16.msra.mxu0 %v2222_v44  ;;  %v645_v44 = vld [vmem:[#allocation7 + $0x1f0] sm:$0xff] }
 0x162   :  { %2225 = vmatprep.subr.bf16.mxu0 %v2224_v45  ;;  %v2266_v45 = vpack.c.bf16 %v645_v44, %v643_v43  ;;  %v945_v44 = vld [vmem:[#allocation7 + $0x240] sm:$0xff] }
 0x165   :  { %2227 = vmatpush1.bf16.msra.mxu0 %v2226_v48 }
 0x168   :  { %380 = vmatmul.mubr.f32.vlgmr.msra.gmra.mrb[0].mxu0 %v281_v49 }
 0x169   :  { %385 = vmatprep.mubr.f32.mxu0 %v3019_v0 }
 0x16c   :  { %386 = vmatmul.mubr.f32.gmra.mrb[2].mxu0 %v282_v50 }
 0x16d   :  { %2039 = vmatprep.mubr.msk.f32.mxu0 %vm392_vm0, %v3362_v52 }
 0x23b   :  { %v381_v53 = vpop.f32.mrb[0].mxu0 }
 0x23c   :  { %v383_v54 = vpop.f32.mrb[1].mxu0 }
 0x23f   :  { %v387_v55 = vpop.f32.mrb[2].mxu0 }
 0x240   :  { %v2232_v56 = vpack.c.bf16 %v387_v55, %v381_v53  ;;  %v389_v57 = vpop.f32.mrb[3].mxu0 }
 0x241   :  { %v2228_v58 = vpack.c.bf16 %v389_v57, %v383_v54 }
 0x243   :  { %2229 = vmatprep.subr.bf16.mxu1 %v2228_v58 }
 0x244   :  { %2231 = vmatpush3.bf16.msra.mxu1 %v2228_v58 }
 0x245   :  { %2233 = vmatprep.subr.bf16.mxu1 %v2232_v56 }
 0x247   :  { %2019 = vmatmul.mubr.msk.f32.vlgmr.msra.gmra.mrb[0].mxu1 %vm392_vm0, %v3366_v59 }
 0x248   :  { %2235 = vmatpush3.bf16.msra.mxu1 %v2232_v56  ;;  %2025 = vmatprep.mubr.msk.f32.mxu1 %vm392_vm0, %v3362_v52 }
 0x249   :  { %2237 = vmatprep.subr.bf16.mxu1 %v2236_v63 }
 0x24f   :  { %2026 = vmatmul.mubr.msk.f32.vlgmr.msra.gmra.mrb[0].mxu1 %vm392_vm0, %v3372_v60 }
 0x250   :  { %711 = vmatprep.mubr.f32.mxu1 %v3019_v0  ;;  %2239 = vmatpush1.bf16.msra.mxu1 %v2238_v3 }
 0x251   :  { %2241 = vmatprep.subr.bf16.mxu1 %v2240_v6 }
 0x254   :  { %2243 = vmatpush1.bf16.msra.mxu1 %v2242_v9 }
 0x255   :  { %2245 = vmatprep.subr.bf16.mxu1 %v2244_v12 }
 0x258   :  { %2247 = vmatpush1.bf16.msra.mxu1 %v2246_v15 }
 0x259   :  { %2249 = vmatprep.subr.bf16.mxu1 %v2248_v18 }
 0x25c   :  { %2251 = vmatpush1.bf16.msra.mxu1 %v2250_v21 }
 0x25d   :  { %2253 = vmatprep.subr.bf16.mxu1 %v2252_v24 }
 0x260   :  { %2255 = vmatpush1.bf16.msra.mxu1 %v2254_v27 }
 0x261   :  { %2257 = vmatprep.subr.bf16.mxu1 %v2256_v30  ;;  %v938_v30 = vld [vmem:[#allocation7 + $0x208] sm:$0xff] }
 0x262   :  { %v2276_v32 = vpack.c.bf16 %v940_v31, %v938_v30 }
 0x264   :  { %2259 = vmatpush1.bf16.msra.mxu1 %v2258_v33  ;;  %v937_v33 = vld [vmem:[#allocation7 + $0x200] sm:$0xff] }
 0x265   :  { %2261 = vmatprep.subr.bf16.mxu1 %v2260_v36  ;;  %v2278_v35 = vpack.c.bf16 %v939_v34, %v937_v33  ;;  %v942_v36 = vld [vmem:[#allocation7 + $0x228] sm:$0xff] }
 0x266   :  { %v2280_v38 = vpack.c.bf16 %v944_v37, %v942_v36 }
 0x268   :  { %2263 = vmatpush1.bf16.msra.mxu1 %v2262_v39  ;;  %v941_v39 = vld [vmem:[#allocation7 + $0x220] sm:$0xff] }
 0x269   :  { %2265 = vmatprep.subr.bf16.mxu1 %v2264_v42  ;;  %v2282_v41 = vpack.c.bf16 %v943_v40, %v941_v39  ;;  %v946_v42 = vld [vmem:[#allocation7 + $0x248] sm:$0xff] }
 0x26c   :  { %2267 = vmatpush1.bf16.msra.mxu1 %v2266_v45  ;;  %v947_v45 = vld [vmem:[#allocation7 + $0x250] sm:$0xff] }
 0x322   :  { %v2027_v47 = vpop.f32.mrb[0].mxu1 }
 0x323   :  { %v563_v48 = vadd.f32 %v2027_v47, %v1897_v46  ;;  %v546_v49 = vpop.f32.mrb[1].mxu1  ;;  %v950_v47 = vld [vmem:[#allocation7 + $0x268] sm:$0xff] }
 0x324   :  { %v562_v50 = vadd.f32 %v1897_v46, %v546_v49  ;;  %v2286_v46 = vpack.c.bf16 %v947_v45, %v945_v44 }
 0x326   :  { %v566_v53 = vadd.f32 %v563_v48, %v562_v50 }
 0x328   :  { %v567_v54 = vrot.slane %v566_v53, 4 }
 0x32a   :  { %v568_v55 = vadd.f32 %v567_v54, %v566_v53  ;;  %v951_v53 = vld [vmem:[#allocation7 + $0x270] sm:$0xff] }
 0x32c   :  { %v569_v56 = vrot.slane %v568_v55, 2 }
 0x32e   :  { %v570_v57 = vadd.f32 %v569_v56, %v568_v55  ;;  %v954_v55 = vld [vmem:[#allocation7 + $0x288] sm:$0xff]  ;;  %v956_v56 = vld [vmem:[#allocation7 + $0x298] sm:$0xff] }
 0x330   :  { %v571_v58 = vrot.slane %v570_v57, 1 }
 0x332   :  { %v572_v61 = vadd.f32 %v571_v58, %v570_v57  ;;  %v2292_v57 = vpack.c.bf16 %v956_v56, %v954_v55  ;;  %v953_v58 = vld [vmem:[#allocation7 + $0x280] sm:$0xff] }
 0x334   :  { %v573_v62 = vmul.f32 0.0625, %v572_v61  ;;  %v955_v61 = vld [vmem:[#allocation7 + $0x290] sm:$0xff] }
 0x336   :  { %v574_v63 = vsub.f32 %v562_v50, %v573_v62  ;;  %v575_v1 = vsub.f32 %v563_v48, %v573_v62  ;;  %v952_v48 = vld [vmem:[#allocation7 + $0x278] sm:$0xff]  ;;  %v949_v50 = vld [vmem:[#allocation7 + $0x260] sm:$0xff]  ;;  %v2294_v62 = vpack.c.bf16 %v955_v61, %v953_v58 }
 0x337   :  { %v2288_v49 = vpack.c.bf16 %v952_v48, %v950_v47  ;;  %v2290_v54 = vpack.c.bf16 %v951_v53, %v949_v50  ;;  %v1905_v48 = vld [vmem:[#allocation10 + $0x1] ss:$0 sm:$0xff]  ;;  %v1906_v53 = vld [vmem:[#allocation11 + $0x1] ss:$0 sm:$0xff] }
 0x338   :  { %v578_v2 = vmul.f32 %v574_v63, %v574_v63  ;;  %v579_v3 = vmul.f32 %v575_v1, %v575_v1 }
 0x33a   :  { %v580_v4 = vadd.f32 %v579_v3, %v578_v2  ;;  %v957_v3 = vld [vmem:[#allocation7 + $0x2a0] sm:$0xff] }
 0x33c   :  { %v581_v5 = vrot.slane %v580_v4, 4 }
 0x33e   :  { %v582_v6 = vadd.f32 %v581_v5, %v580_v4  ;;  %v959_v4 = vld [vmem:[#allocation7 + $0x2b0] sm:$0xff] }
 0x33f   :  { %v2298_v5 = vpack.c.bf16 %v959_v4, %v957_v3 }
 0x340   :  { %v583_v7 = vrot.slane %v582_v6, 2 }
 0x342   :  { %v584_v8 = vadd.f32 %v583_v7, %v582_v6  ;;  %v962_v6 = vld [vmem:[#allocation7 + $0x2c8] sm:$0xff]  ;;  %v964_v7 = vld [vmem:[#allocation7 + $0x2d8] sm:$0xff] }
 0x344   :  { %v585_v9 = vrot.slane %v584_v8, 1 }
 0x346   :  { %v586_v10 = vadd.f32 %v585_v9, %v584_v8  ;;  %v2300_v8 = vpack.c.bf16 %v964_v7, %v962_v6  ;;  %v961_v9 = vld [vmem:[#allocation7 + $0x2c0] sm:$0xff] }
 0x347   :  { %v1259_v6 = vld [vmem:[#allocation13 + $0x18] sm:$0xff] }
 0x348   :  { %v587_v11 = vmul.f32 0.0625, %v586_v10  ;;  %v963_v10 = vld [vmem:[#allocation7 + $0x2d0] sm:$0xff] }
 0x34a   :  { %v588_v12 = vadd.f32 1e-05, %v587_v11  ;;  %v2302_v11 = vpack.c.bf16 %v963_v10, %v961_v9  ;;  %v1258_v9 = vld [vmem:[#allocation13 + $0x10] sm:$0xff] }
 0x34c   :  { %2508 = vrsqrt.f32 %v588_v12  ;;  %v966_v12 = vld [vmem:[#allocation7 + $0x2e8] sm:$0xff] }
 0x356   :  { %v2509_v13 = vpop.eup %2508 }
 0x357   :  { %v590_v15 = vmul.f32 %v2509_v13, %v574_v63  ;;  %v591_v16 = vmul.f32 %v2509_v13, %v575_v1  ;;  %v958_v63 = vld [vmem:[#allocation7 + $0x2a8] sm:$0xff]  ;;  %v960_v1 = vld [vmem:[#allocation7 + $0x2b8] sm:$0xff] }
 0x358   :  { %v2296_v2 = vpack.c.bf16 %v960_v1, %v958_v63  ;;  %v968_v13 = vld [vmem:[#allocation7 + $0x2f8] sm:$0xff] }
 0x359   :  { %v599_v18 = vmul.f32 %v1898_v14, %v590_v15  ;;  %v600_v19 = vmul.f32 %v1898_v14, %v591_v16  ;;  %v2304_v14 = vpack.c.bf16 %v968_v13, %v966_v12  ;;  %v965_v15 = vld [vmem:[#allocation7 + $0x2e0] sm:$0xff]  ;;  %v967_v16 = vld [vmem:[#allocation7 + $0x2f0] sm:$0xff] }
 0x35a   :  { %v1263_v12 = vld [vmem:[#allocation13 + $0x38] sm:$0xff]  ;;  %v1260_v13 = vld [vmem:[#allocation13 + $0x20] sm:$0xff] }
 0x35b   :  { %v608_v20 = vadd.f32 %v1899_v17, %v599_v18  ;;  %v609_v22 = vadd.f32 %v1899_v17, %v600_v19  ;;  %v2306_v17 = vpack.c.bf16 %v967_v16, %v965_v15 }
 0x35d   :  { %v610_v21 = vmax.f32 %v608_v20, 0.0  ;;  %v611_v23 = vmax.f32 %v609_v22, 0.0  ;;  %v1904_v20 = vld [vmem:[#allocation8 + $0x1] ss:$0 sm:$0xff] }
 0x35f   :  { %712 = vmatmul.mubr.f32.vlgmr.msra.gmra.mrb[2].mxu1 %v610_v21 }
 0x360   :  { %717 = vmatprep.mubr.f32.mxu1 %v3019_v0 }
 0x363   :  { %718 = vmatmul.mubr.f32.gmra.mrb[4].mxu1 %v611_v23 }
 0x364   :  { %2032 = vmatprep.mubr.msk.f32.mxu1 %vm392_vm0, %v3358_v51 }
 0x432   :  { %v713_v24 = vpop.f32.mrb[2].mxu1 }
 0x433   :  { %v715_v25 = vpop.f32.mrb[3].mxu1 }
 0x436   :  { %v719_v26 = vpop.f32.mrb[4].mxu1 }
 0x437   :  { %v2272_v27 = vpack.c.bf16 %v719_v26, %v713_v24  ;;  %v721_v28 = vpop.f32.mrb[5].mxu1 }
 0x438   :  { %v2268_v29 = vpack.c.bf16 %v721_v28, %v715_v25 }
 0x439   :  { %2273 = vmatprep.subr.bf16.mxu0 %v2272_v27 }
 0x43a   :  { %2269 = vmatprep.subr.bf16.mxu1 %v2268_v29  ;;  %2275 = vmatpush3.bf16.msra.mxu0 %v2272_v27 }
 0x43b   :  { %2271 = vmatpush3.bf16.msra.mxu1 %v2268_v29 }
 0x43c   :  { %2277 = vmatprep.subr.bf16.mxu1 %v2276_v32 }
 0x43d   :  { %2040 = vmatmul.mubr.msk.f32.vlgmr.msra.gmra.mrb[4].mxu0 %vm392_vm0, %v3372_v60 }
 0x43e   :  { %2033 = vmatmul.mubr.msk.f32.vlgmr.msra.gmra.mrb[6].mxu1 %vm392_vm0, %v3366_v59  ;;  %2046 = vmatprep.mubr.msk.f32.mxu0 %vm392_vm0, %v3358_v51  ;;  %v948_v51 = vld [vmem:[#allocation7 + $0x258] sm:$0xff] }
 0x43f   :  { %1033 = vmatprep.mubr.f32.mxu1 %v3019_v0  ;;  %2279 = vmatpush1.bf16.msra.mxu1 %v2278_v35  ;;  %v2284_v43 = vpack.c.bf16 %v948_v51, %v946_v42 }
 0x440   :  { %2281 = vmatprep.subr.bf16.mxu1 %v2280_v38 }
 0x443   :  { %2283 = vmatpush1.bf16.msra.mxu1 %v2282_v41 }
 0x444   :  { %2285 = vmatprep.subr.bf16.mxu1 %v2284_v43 }
 0x447   :  { %2287 = vmatpush1.bf16.msra.mxu1 %v2286_v46 }
 0x448   :  { %2289 = vmatprep.subr.bf16.mxu1 %v2288_v49 }
 0x44b   :  { %2291 = vmatpush1.bf16.msra.mxu1 %v2290_v54 }
 0x44c   :  { %2293 = vmatprep.subr.bf16.mxu1 %v2292_v57 }
 0x44f   :  { %2295 = vmatpush1.bf16.msra.mxu1 %v2294_v62 }
 0x450   :  { %2297 = vmatprep.subr.bf16.mxu1 %v2296_v2 }
 0x453   :  { %2299 = vmatpush1.bf16.msra.mxu1 %v2298_v5  ;;  %v1257_v5 = vld [vmem:[#allocation13 + $0x8] sm:$0xff] }
 0x454   :  { %2301 = vmatprep.subr.bf16.mxu1 %v2300_v8  ;;  %v2316_v7 = vpack.c.bf16 %v1259_v6, %v1257_v5  ;;  %v1256_v8 = vld [vmem:[#allocation13] sm:$0xff] }
 0x455   :  { %v2318_v10 = vpack.c.bf16 %v1258_v9, %v1256_v8 }
 0x457   :  { %2303 = vmatpush1.bf16.msra.mxu1 %v2302_v11  ;;  %v1261_v11 = vld [vmem:[#allocation13 + $0x28] sm:$0xff] }
 0x458   :  { %2305 = vmatprep.subr.bf16.mxu1 %v2304_v14  ;;  %v1262_v14 = vld [vmem:[#allocation13 + $0x30] sm:$0xff] }
 0x459   :  { %v2322_v15 = vpack.c.bf16 %v1262_v14, %v1260_v13 }
 0x45b   :  { %2307 = vmatpush1.bf16.msra.mxu1 %v2306_v17  ;;  %v1264_v17 = vld [vmem:[#allocation13 + $0x40] sm:$0xff] }
 0x510   :  { %v2041_v18 = vpop.f32.mrb[4].mxu0 }
 0x511   :  { %v2034_v19 = vpop.f32.mrb[6].mxu1  ;;  %v865_v21 = vpop.f32.mrb[5].mxu0 }
 0x512   :  { %v871_v22 = vadd.f32 %v2041_v18, %v2034_v19  ;;  %v790_v23 = vpop.f32.mrb[7].mxu1  ;;  %v1266_v18 = vld [vmem:[#allocation13 + $0x50] sm:$0xff] }
 0x513   :  { %v866_v24 = vadd.f32 %v865_v21, %v790_v23  ;;  %v2326_v19 = vpack.c.bf16 %v1266_v18, %v1264_v17  ;;  %v1271_v21 = vld [vmem:[#allocation13 + $0x78] sm:$0xff]  ;;  %v1268_v23 = vld [vmem:[#allocation13 + $0x60] sm:$0xff] }
 0x514   :  { %v883_v25 = vadd.f32 %v1904_v20, %v871_v22 }
 0x515   :  { %v882_v26 = vadd.f32 %v1904_v20, %v866_v24  ;;  %v1269_v20 = vld [vmem:[#allocation13 + $0x68] sm:$0xff]  ;;  %v1270_v24 = vld [vmem:[#allocation13 + $0x70] sm:$0xff] }
 0x516   :  { %v2328_v22 = vpack.c.bf16 %v1271_v21, %v1269_v20 }
 0x517   :  { %v886_v27 = vadd.f32 %v883_v25, %v882_v26 }
 0x519   :  { %v887_v28 = vrot.slane %v886_v27, 4 }
 0x51b   :  { %v888_v29 = vadd.f32 %v887_v28, %v886_v27  ;;  %v1275_v27 = vld [vmem:[#allocation13 + $0x98] sm:$0xff] }
 0x51d   :  { %v889_v30 = vrot.slane %v888_v29, 2 }
 0x51f   :  { %v890_v31 = vadd.f32 %v889_v30, %v888_v29  ;;  %v1272_v29 = vld [vmem:[#allocation13 + $0x80] sm:$0xff]  ;;  %v1274_v30 = vld [vmem:[#allocation13 + $0x90] sm:$0xff] }
 0x521   :  { %v891_v32 = vrot.slane %v890_v31, 1 }
 0x523   :  { %v892_v33 = vadd.f32 %v891_v32, %v890_v31  ;;  %v2334_v31 = vpack.c.bf16 %v1274_v30, %v1272_v29  ;;  %v1277_v32 = vld [vmem:[#allocation13 + $0xa8] sm:$0xff]  ;;  %v1913_v29 = vld [vmem:[#allocation11 + $0x2] ss:$0 sm:$0xff] }
 0x525   :  { %v893_v34 = vmul.f32 0.0625, %v892_v33  ;;  %v1279_v33 = vld [vmem:[#allocation13 + $0xb8] sm:$0xff] }
 0x527   :  { %v894_v35 = vsub.f32 %v882_v26, %v893_v34  ;;  %v895_v36 = vsub.f32 %v883_v25, %v893_v34  ;;  %v2330_v25 = vpack.c.bf16 %v1270_v24, %v1268_v23  ;;  %v1273_v26 = vld [vmem:[#allocation13 + $0x88] sm:$0xff]  ;;  %v2336_v34 = vpack.c.bf16 %v1279_v33, %v1277_v32 }
 0x528   :  { %v2332_v28 = vpack.c.bf16 %v1275_v27, %v1273_v26  ;;  %v1912_v26 = vld [vmem:[#allocation10 + $0x2] ss:$0 sm:$0xff] }
 0x529   :  { %v898_v37 = vmul.f32 %v894_v35, %v894_v35  ;;  %v899_v38 = vmul.f32 %v895_v36, %v895_v36 }
 0x52b   :  { %v900_v39 = vadd.f32 %v899_v38, %v898_v37  ;;  %v1281_v38 = vld [vmem:[#allocation13 + $0xc8] sm:$0xff] }
 0x52d   :  { %v901_v40 = vrot.slane %v900_v39, 4 }
 0x52f   :  { %v902_v41 = vadd.f32 %v901_v40, %v900_v39  ;;  %v1283_v39 = vld [vmem:[#allocation13 + $0xd8] sm:$0xff] }
 0x530   :  { %v2340_v40 = vpack.c.bf16 %v1283_v39, %v1281_v38  ;;  %v1404_v38 = vld [vmem:[#allocation16 + $0x58] sm:$0xff] }
 0x531   :  { %v903_v42 = vrot.slane %v902_v41, 2 }
 0x533   :  { %v904_v51 = vadd.f32 %v903_v42, %v902_v41  ;;  %v1280_v41 = vld [vmem:[#allocation13 + $0xc0] sm:$0xff]  ;;  %v1282_v42 = vld [vmem:[#allocation13 + $0xd0] sm:$0xff] }
 0x535   :  { %v905_v43 = vrot.slane %v904_v51, 1 }
 0x537   :  { %v906_v44 = vadd.f32 %v905_v43, %v904_v51  ;;  %v2342_v51 = vpack.c.bf16 %v1282_v42, %v1280_v41  ;;  %v1285_v43 = vld [vmem:[#allocation13 + $0xe8] sm:$0xff] }
 0x538   :  { %v1406_v41 = vld [vmem:[#allocation16 + $0x68] sm:$0xff] }
 0x539   :  { %v907_v45 = vmul.f32 0.0625, %v906_v44  ;;  %v1287_v44 = vld [vmem:[#allocation13 + $0xf8] sm:$0xff] }
 0x53b   :  { %v908_v46 = vadd.f32 1e-05, %v907_v45  ;;  %v2344_v45 = vpack.c.bf16 %v1287_v44, %v1285_v43  ;;  %v1408_v43 = vld [vmem:[#allocation16 + $0x78] sm:$0xff]  ;;  %v1591_v44 = vld [vmem:[#allocation22] sm:$0xff] }
 0x53d   :  { %2510 = vrsqrt.f32 %v908_v46  ;;  %v1284_v46 = vld [vmem:[#allocation13 + $0xe0] sm:$0xff] }
 0x547   :  { %v2511_v47 = vpop.eup %2510 }
 0x548   :  { %v910_v49 = vmul.f32 %v2511_v47, %v894_v35  ;;  %v911_v50 = vmul.f32 %v2511_v47, %v895_v36  ;;  %v1276_v35 = vld [vmem:[#allocation13 + $0xa0] sm:$0xff]  ;;  %v1278_v36 = vld [vmem:[#allocation13 + $0xb0] sm:$0xff] }
 0x549   :  { %v2338_v37 = vpack.c.bf16 %v1278_v36, %v1276_v35  ;;  %v1286_v47 = vld [vmem:[#allocation13 + $0xf0] sm:$0xff] }
 0x54a   :  { %v920_v54 = vmul.f32 %v1905_v48, %v910_v49  ;;  %v921_v55 = vmul.f32 %v1905_v48, %v911_v50  ;;  %v2346_v48 = vpack.c.bf16 %v1286_v47, %v1284_v46  ;;  %v1393_v49 = vld [vmem:[#allocation16] sm:$0xff]  ;;  %v1394_v50 = vld [vmem:[#allocation16 + $0x8] sm:$0xff]  ;;  %v1290_v47 = vlaneseq }
 0x54b   :  { %v1402_v35 = vld [vmem:[#allocation16 + $0x48] sm:$0xff] }
 0x54c   :  { %v930_v56 = vadd.f32 %v1906_v53, %v920_v54  ;;  %v931_v58 = vadd.f32 %v1906_v53, %v921_v55  ;;  %v1395_v53 = vld [vmem:[#allocation16 + $0x10] sm:$0xff]  ;;  %v2348_v54 = vpack.c.bf16 %v1394_v50, %v1393_v49  ;;  %v1396_v55 = vld [vmem:[#allocation16 + $0x18] sm:$0xff] }
 0x54d   :  { %v1288_v50 = vld [vmem:[#allocation14] sm:$0x3] }
 0x54e   :  { %v932_v57 = vmax.f32 %v930_v56, 0.0  ;;  %v933_v61 = vmax.f32 %v931_v58, 0.0  ;;  %v2352_v56 = vpack.c.bf16 %v1396_v55, %v1395_v53  ;;  %v1398_v58 = vld [vmem:[#allocation16 + $0x28] sm:$0xff]  ;;  %2349 = vmatprep.subr.bf16.mxu1 %v2348_v54 }
 0x550   :  { %1034 = vmatmul.mubr.f32.vlgmr.msra.gmra.mrb[8].mxu1 %v932_v57  ;;  %v1397_v57 = vld [vmem:[#allocation16 + $0x20] sm:$0xff] }
 0x551   :  { %1039 = vmatprep.mubr.f32.mxu1 %v3019_v0  ;;  %2351 = vmatpush3.bf16.msra.mxu1 %v2348_v54 }
 0x552   :  { %2353 = vmatprep.subr.bf16.mxu1 %v2352_v56 }
 0x554   :  { %1040 = vmatmul.mubr.f32.gmra.mrb[10].mxu1 %v933_v61  ;;  %v2356_v61 = vpack.c.bf16 %v1398_v58, %v1397_v57 }
 0x555   :  { %2355 = vmatpush3.bf16.msra.mxu1 %v2352_v56 }
 0x556   :  { %2357 = vmatprep.subr.bf16.mxu1 %v2356_v61 }
 0x559   :  { %2359 = vmatpush3.bf16.msra.mxu1 %v2356_v61 }
 0x623   :  { %v1035_v62 = vpop.f32.mrb[8].mxu1 }
 0x624   :  { %v1037_v63 = vpop.f32.mrb[9].mxu1 }
 0x627   :  { %v1041_v1 = vpop.f32.mrb[10].mxu1 }
 0x628   :  { %v2312_v2 = vpack.c.bf16 %v1041_v1, %v1035_v62  ;;  %v1043_v3 = vpop.f32.mrb[11].mxu1  ;;  %v1399_v62 = vld [vmem:[#allocation16 + $0x30] sm:$0xff] }
 0x629   :  { %v2308_v4 = vpack.c.bf16 %v1043_v3, %v1037_v63  ;;  %v1400_v63 = vld [vmem:[#allocation16 + $0x38] sm:$0xff] }
 0x62a   :  { %v2360_v1 = vpack.c.bf16 %v1400_v63, %v1399_v62 }
 0x62b   :  { %2309 = vmatprep.subr.bf16.mxu0 %v2308_v4 }
 0x62c   :  { %2311 = vmatpush3.bf16.msra.mxu0 %v2308_v4  ;;  %2361 = vmatprep.subr.bf16.mxu1 %v2360_v1 }
 0x62d   :  { %2313 = vmatprep.subr.bf16.mxu0 %v2312_v2  ;;  %2363 = vmatpush3.bf16.msra.mxu1 %v2360_v1 }
 0x62f   :  { %2047 = vmatmul.mubr.msk.f32.vlgmr.msra.gmra.mrb[6].mxu0 %vm392_vm0, %v3366_v59  ;;  %v2320_v59 = vpack.c.bf16 %v1263_v12, %v1261_v11 }
 0x630   :  { %2315 = vmatpush3.bf16.msra.mxu0 %v2312_v2  ;;  %2053 = vmatprep.mubr.msk.f32.mxu0 %vm392_vm0, %v3362_v52  ;;  %v1265_v52 = vld [vmem:[#allocation13 + $0x48] sm:$0xff]  ;;  %v1911_v2 = vld [vmem:[#allocation8 + $0x2] ss:$0 sm:$0xff] }
 0x631   :  { %2317 = vmatprep.subr.bf16.mxu0 %v2316_v7 }
 0x637   :  { %2054 = vmatmul.mubr.msk.f32.vlgmr.msra.gmra.mrb[6].mxu0 %vm392_vm0, %v3372_v60  ;;  %v1267_v60 = vld [vmem:[#allocation13 + $0x58] sm:$0xff] }
 0x638   :  { %1364 = vmatprep.mubr.f32.mxu0 %v3019_v0  ;;  %2319 = vmatpush1.bf16.msra.mxu0 %v2318_v10  ;;  %v2324_v16 = vpack.c.bf16 %v1267_v60, %v1265_v52 }
 0x639   :  { %2321 = vmatprep.subr.bf16.mxu0 %v2320_v59 }
 0x63c   :  { %2323 = vmatpush1.bf16.msra.mxu0 %v2322_v15 }
 0x63d   :  { %2325 = vmatprep.subr.bf16.mxu0 %v2324_v16 }
 0x640   :  { %2327 = vmatpush1.bf16.msra.mxu0 %v2326_v19 }
 0x641   :  { %2329 = vmatprep.subr.bf16.mxu0 %v2328_v22 }
 0x644   :  { %2331 = vmatpush1.bf16.msra.mxu0 %v2330_v25 }
 0x645   :  { %2333 = vmatprep.subr.bf16.mxu0 %v2332_v28 }
 0x648   :  { %2335 = vmatpush1.bf16.msra.mxu0 %v2334_v31 }
 0x649   :  { %2337 = vmatprep.subr.bf16.mxu0 %v2336_v34  ;;  %v1401_v34 = vld [vmem:[#allocation16 + $0x40] sm:$0xff] }
 0x64a   :  { %v2364_v36 = vpack.c.bf16 %v1402_v35, %v1401_v34  ;;  %v1498_v34 = vld [vmem:[#allocation19 + $0x28] sm:$0xff] }
 0x64c   :  { %2339 = vmatpush1.bf16.msra.mxu0 %v2338_v37  ;;  %2365 = vmatprep.subr.bf16.mxu1 %v2364_v36  ;;  %v1403_v37 = vld [vmem:[#allocation16 + $0x50] sm:$0xff] }
 0x64d   :  { %2341 = vmatprep.subr.bf16.mxu0 %v2340_v40  ;;  %2367 = vmatpush3.bf16.msra.mxu1 %v2364_v36  ;;  %v2368_v39 = vpack.c.bf16 %v1404_v38, %v1403_v37  ;;  %v1405_v40 = vld [vmem:[#allocation16 + $0x60] sm:$0xff]  ;;  %v1499_v36 = vld [vmem:[#allocation19 + $0x30] sm:$0xff] }
 0x64e   :  { %v2372_v42 = vpack.c.bf16 %v1406_v41, %v1405_v40  ;;  %v1500_v37 = vld [vmem:[#allocation19 + $0x38] sm:$0xff]  ;;  %v1502_v40 = vld [vmem:[#allocation19 + $0x48] sm:$0xff] }
 0x64f   :  { %2369 = vmatprep.subr.bf16.mxu1 %v2368_v39  ;;  %v2392_v38 = vpack.c.bf16 %v1500_v37, %v1499_v36 }
 0x650   :  { %2343 = vmatpush1.bf16.msra.mxu0 %v2342_v51  ;;  %v1407_v51 = vld [vmem:[#allocation16 + $0x70] sm:$0xff] }
 0x651   :  { %2345 = vmatprep.subr.bf16.mxu0 %v2344_v45  ;;  %2371 = vmatpush3.bf16.msra.mxu1 %v2368_v39  ;;  %v1592_v45 = vld [vmem:[#allocation22 + $0x8] sm:$0xff]  ;;  %v1501_v39 = vld [vmem:[#allocation19 + $0x40] sm:$0xff] }
 0x652   :  { %2373 = vmatprep.subr.bf16.mxu1 %v2372_v42  ;;  %v2412_v46 = vpack.c.bf16 %v1592_v45, %v1591_v44  ;;  %v2396_v41 = vpack.c.bf16 %v1502_v40, %v1501_v39  ;;  %v1506_v44 = vld [vmem:[#allocation19 + $0x68] sm:$0xff] }
 0x654   :  { %2347 = vmatpush1.bf16.msra.mxu0 %v2346_v48  ;;  %v1291_v48 = vshrl.u32 %v1290_v47, 7  ;;  %v1508_v47 = vld [vmem:[#allocation19 + $0x78] sm:$0xff] }
 0x655   :  { %2375 = vmatpush3.bf16.msra.mxu1 %v2372_v42  ;;  %v1503_v42 = vld [vmem:[#allocation19 + $0x50] sm:$0xff] }
 0x656   :  { %v1292_v49 = vsub.s32 0, %v1291_v48  ;;  %v1296_v53 = vsub.s32 1, %v1291_v48 }
 0x658   :  { %v1293_v54 = vrot.slane %v1288_v50, %v1292_v49  ;;  %v1297_v55 = vrot.slane %v1288_v50, %v1296_v53  ;;  %v1691_v49 = vld [vmem:[#allocation25] sm:$0xff]  ;;  %v1692_v50 = vld [vmem:[#allocation25 + $0x8] sm:$0xff] }
 0x659   :  { %v2444_v53 = vpack.c.bf16 %v1692_v50, %v1691_v49 }
 0x70a   :  { %v2055_v3 = vpop.f32.mrb[6].mxu0 }
 0x70b   :  { %v1205_v4 = vadd.f32 %v2055_v3, %v1911_v2  ;;  %v1187_v5 = vpop.f32.mrb[7].mxu0 }
 0x70c   :  { %v1204_v6 = vadd.f32 %v1911_v2, %v1187_v5  ;;  %v1594_v5 = vld [vmem:[#allocation22 + $0x18] sm:$0xff] }
 0x70e   :  { %v1208_v7 = vadd.f32 %v1205_v4, %v1204_v6 }
 0x710   :  { %v1209_v8 = vrot.slane %v1208_v7, 4 }
 0x712   :  { %v1210_v9 = vadd.f32 %v1209_v8, %v1208_v7 }
 0x714   :  { %v1211_v10 = vrot.slane %v1210_v9, 2 }
 0x716   :  { %v1212_v11 = vadd.f32 %v1211_v10, %v1210_v9  ;;  %v1595_v10 = vld [vmem:[#allocation22 + $0x20] sm:$0xff] }
 0x718   :  { %v1213_v12 = vrot.slane %v1212_v11, 1 }
 0x71a   :  { %v1214_v59 = vadd.f32 %v1213_v12, %v1212_v11  ;;  %v1596_v11 = vld [vmem:[#allocation22 + $0x28] sm:$0xff] }
 0x71c   :  { %v1215_v13 = vmul.f32 0.0625, %v1214_v59 }
 0x71e   :  { %v1216_v14 = vsub.f32 %v1204_v6, %v1215_v13  ;;  %v1217_v15 = vsub.f32 %v1205_v4, %v1215_v13  ;;  %v1593_v4 = vld [vmem:[#allocation22 + $0x10] sm:$0xff]  ;;  %v2420_v13 = vpack.c.bf16 %v1596_v11, %v1595_v10 }
 0x71f   :  { %v2416_v8 = vpack.c.bf16 %v1594_v5, %v1593_v4 }
 0x720   :  { %v1220_v52 = vmul.f32 %v1216_v14, %v1216_v14  ;;  %v1221_v60 = vmul.f32 %v1217_v15, %v1217_v15 }
 0x722   :  { %v1222_v16 = vadd.f32 %v1221_v60, %v1220_v52  ;;  %v1599_v60 = vld [vmem:[#allocation22 + $0x40] sm:$0xff] }
 0x724   :  { %v1223_v17 = vrot.slane %v1222_v16, 4 }
 0x726   :  { %v1224_v18 = vadd.f32 %v1223_v17, %v1222_v16  ;;  %v1600_v16 = vld [vmem:[#allocation22 + $0x48] sm:$0xff] }
 0x727   :  { %v2428_v17 = vpack.c.bf16 %v1600_v16, %v1599_v60  ;;  %v1700_v60 = vld [vmem:[#allocation25 + $0x48] sm:$0xff] }
 0x728   :  { %v1225_v19 = vrot.slane %v1224_v18, 2 }
 0x72a   :  { %v1226_v20 = vadd.f32 %v1225_v19, %v1224_v18  ;;  %v1601_v18 = vld [vmem:[#allocation22 + $0x50] sm:$0xff]  ;;  %v1602_v19 = vld [vmem:[#allocation22 + $0x58] sm:$0xff] }
 0x72c   :  { %v1227_v21 = vrot.slane %v1226_v20, 1 }
 0x72e   :  { %v1228_v22 = vadd.f32 %v1227_v21, %v1226_v20  ;;  %v2432_v20 = vpack.c.bf16 %v1602_v19, %v1601_v18  ;;  %v1603_v21 = vld [vmem:[#allocation22 + $0x60] sm:$0xff] }
 0x72f   :  { %v1702_v18 = vld [vmem:[#allocation25 + $0x58] sm:$0xff] }
 0x730   :  { %v1229_v23 = vmul.f32 0.0625, %v1228_v22  ;;  %v1604_v22 = vld [vmem:[#allocation22 + $0x68] sm:$0xff] }
 0x732   :  { %v1230_v24 = vadd.f32 1e-05, %v1229_v23  ;;  %v1605_v23 = vld [vmem:[#allocation22 + $0x70] sm:$0xff] }
 0x734   :  { %2512 = vrsqrt.f32 %v1230_v24  ;;  %v2436_v24 = vpack.c.bf16 %v1604_v22, %v1603_v21  ;;  %v1704_v21 = vld [vmem:[#allocation25 + $0x68] sm:$0xff] }
 0x73e   :  { %v2513_v25 = vpop.eup %2512 }
 0x73f   :  { %v1232_v27 = vmul.f32 %v2513_v25, %v1216_v14  ;;  %v1233_v28 = vmul.f32 %v2513_v25, %v1217_v15  ;;  %v1597_v14 = vld [vmem:[#allocation22 + $0x30] sm:$0xff]  ;;  %v1598_v15 = vld [vmem:[#allocation22 + $0x38] sm:$0xff] }
 0x740   :  { %v2424_v52 = vpack.c.bf16 %v1598_v15, %v1597_v14  ;;  %v1606_v25 = vld [vmem:[#allocation22 + $0x78] sm:$0xff] }
 0x741   :  { %v1242_v30 = vmul.f32 %v1912_v26, %v1232_v27  ;;  %v1243_v32 = vmul.f32 %v1912_v26, %v1233_v28  ;;  %v2440_v26 = vpack.c.bf16 %v1606_v25, %v1605_v23  ;;  %v1493_v27 = vld [vmem:[#allocation19] sm:$0xff]  ;;  %v1494_v28 = vld [vmem:[#allocation19 + $0x8] sm:$0xff]  ;;  %v1705_v23 = vld [vmem:[#allocation25 + $0x70] sm:$0xff] }
 0x742   :  { %v1698_v14 = vld [vmem:[#allocation25 + $0x38] sm:$0xff] }
 0x743   :  { %v1252_v31 = vadd.f32 %v1913_v29, %v1242_v30  ;;  %v1253_v33 = vadd.f32 %v1913_v29, %v1243_v32  ;;  %v1495_v29 = vld [vmem:[#allocation19 + $0x10] sm:$0xff]  ;;  %v2380_v30 = vpack.c.bf16 %v1494_v28, %v1493_v27 }
 0x745   :  { %1365 = vmatmul.mubr.f32.vlgmr.msra.gmra.mrb[8].mxu0 %v1252_v31  ;;  %v1496_v31 = vld [vmem:[#allocation19 + $0x18] sm:$0xff]  ;;  %2381 = vmatprep.subr.bf16.mxu0 %v2380_v30 }
 0x746   :  { %1370 = vmatprep.mubr.f32.mxu0 %v3019_v0  ;;  %v2376_v0 = vpack.c.bf16 %v1408_v43, %v1407_v51  ;;  %v2384_v32 = vpack.c.bf16 %v1496_v31, %v1495_v29  ;;  %2383 = vmatpush3.bf16.msra.mxu0 %v2380_v30  ;;  %v1504_v51 = vld [vmem:[#allocation19 + $0x58] sm:$0xff] }
 0x747   :  { %v2400_v43 = vpack.c.bf16 %v1504_v51, %v1503_v42 }
 0x748   :  { %2377 = vmatprep.subr.bf16.mxu1 %v2376_v0  ;;  %2385 = vmatprep.subr.bf16.mxu0 %v2384_v32 }
 0x749   :  { %1371 = vmatmul.mubr.f32.gmra.mrb[10].mxu0 %v1253_v33  ;;  %2379 = vmatpush3.bf16.msra.mxu1 %v2376_v0  ;;  %v1497_v33 = vld [vmem:[#allocation19 + $0x20] sm:$0xff] }
 0x74a   :  { %2413 = vmatprep.subr.bf16.mxu1 %v2412_v46  ;;  %v2388_v35 = vpack.c.bf16 %v1498_v34, %v1497_v33  ;;  %2387 = vmatpush3.bf16.msra.mxu0 %v2384_v32  ;;  %v1505_v0 = vld [vmem:[#allocation19 + $0x60] sm:$0xff] }
 0x74b   :  { %v2404_v45 = vpack.c.bf16 %v1506_v44, %v1505_v0  ;;  %v1915_v33 = vld [vmem:[#allocation20] ss:$0 sm:$0xff] }
 0x74c   :  { %2389 = vmatprep.subr.bf16.mxu0 %v2388_v35 }
 0x74e   :  { %2391 = vmatpush3.bf16.msra.mxu0 %v2388_v35 }
 0x74f   :  { %2393 = vmatprep.subr.bf16.mxu0 %v2392_v38 }
 0x752   :  { %2395 = vmatpush3.bf16.msra.mxu0 %v2392_v38 }
 0x753   :  { %2397 = vmatprep.subr.bf16.mxu0 %v2396_v41 }
 0x756   :  { %2399 = vmatpush3.bf16.msra.mxu0 %v2396_v41 }
 0x757   :  { %2401 = vmatprep.subr.bf16.mxu0 %v2400_v43 }
 0x75a   :  { %2403 = vmatpush3.bf16.msra.mxu0 %v2400_v43  ;;  %v1917_v43 = vld [vmem:[#allocation26] ss:$0 sm:$0xff] }
 0x75b   :  { %2405 = vmatprep.subr.bf16.mxu0 %v2404_v45 }
 0x75e   :  { %2407 = vmatpush3.bf16.msra.mxu0 %v2404_v45 }
 0x818   :  { %v1366_v56 = vpop.f32.mrb[8].mxu0 }
 0x819   :  { %v1367_v57 = vadd.f32 %v1366_v56, %v1293_v54  ;;  %v1368_v58 = vpop.f32.mrb[9].mxu0 }
 0x81a   :  { %v1369_v61 = vadd.f32 %v1368_v58, %v1297_v55 }
 0x81b   :  { %2514 = vtanh.f32 %v1367_v57 }
 0x81c   :  { %2516 = vtanh.f32 %v1369_v61  ;;  %v1372_v62 = vpop.f32.mrb[10].mxu0 }
 0x81d   :  { %v1373_v63 = vadd.f32 %v1372_v62, %v1293_v54  ;;  %v1374_v1 = vpop.f32.mrb[11].mxu0 }
 0x81e   :  { %v1375_v2 = vadd.f32 %v1374_v1, %v1297_v55  ;;  %v1914_v1 = vld [vmem:[#allocation17] ss:$0 sm:$0xff] }
 0x81f   :  { %2518 = vtanh.f32 %v1373_v63 }
 0x820   :  { %2520 = vtanh.f32 %v1375_v2 }
 0x825   :  { %v2515_v3 = vpop.eup %2514 }
 0x826   :  { %v3396_v6 = vpop.eup %2516  ;;  %1789 = vst [vmem:[#allocation28] sm:$0xff] %v2515_v3  ;;  %2088 = vmatprep.mubr.f32.mxu1 %v2515_v3 }
 0x827   :  { %v1381_v7 = vmul.f32 %v3396_v6, %v3396_v6 }
 0x829   :  { %v2519_v9 = vpop.eup %2518  ;;  %1383 = vadd.xlane.f32.xlu0 %v1381_v7  ;;  %v1693_v7 = vld [vmem:[#allocation25 + $0x10] sm:$0xff] }
 0x82a   :  { %v3400_v12 = vpop.eup %2520  ;;  %1790 = vst [vmem:[#allocation28 + $0x8] sm:$0xff] %v2519_v9  ;;  %2089 = vmatmul.mubr.f32.vlgmr.msra.gmra.mrb[12].mxu1 %v2519_v9 }
 0x82b   :  { %v1382_v59 = vmul.f32 %v3400_v12, %v3400_v12  ;;  %2415 = vmatpush3.bf16.msra.mxu1 %v2412_v46  ;;  %v1507_v46 = vld [vmem:[#allocation19 + $0x70] sm:$0xff] }
 0x82c   :  { %2417 = vmatprep.subr.bf16.mxu1 %v2416_v8  ;;  %v2408_v48 = vpack.c.bf16 %v1508_v47, %v1507_v46 }
 0x82d   :  { %1385 = vadd.xlane.f32.xlu0 %v1382_v59  ;;  %v1695_v59 = vld [vmem:[#allocation25 + $0x20] sm:$0xff] }
 0x82e   :  { %2409 = vmatprep.subr.bf16.mxu0 %v2408_v48 }
 0x82f   :  { %2419 = vmatpush3.bf16.msra.mxu1 %v2416_v8  ;;  %2411 = vmatpush3.bf16.msra.mxu0 %v2408_v48  ;;  %v1694_v8 = vld [vmem:[#allocation25 + $0x18] sm:$0xff] }
 0x830   :  { %2421 = vmatprep.subr.bf16.mxu1 %v2420_v13  ;;  %2445 = vmatprep.subr.bf16.mxu0 %v2444_v53  ;;  %v2448_v11 = vpack.c.bf16 %v1694_v8, %v1693_v7 }
 0x833   :  { %2423 = vmatpush3.bf16.msra.mxu1 %v2420_v13 }
 0x834   :  { %2425 = vmatprep.subr.bf16.mxu1 %v2424_v52 }
 0x837   :  { %2427 = vmatpush3.bf16.msra.mxu1 %v2424_v52  ;;  %v1699_v52 = vld [vmem:[#allocation25 + $0x40] sm:$0xff] }
 0x838   :  { %2429 = vmatprep.subr.bf16.mxu1 %v2428_v17  ;;  %v2460_v16 = vpack.c.bf16 %v1700_v60, %v1699_v52 }
 0x83b   :  { %2431 = vmatpush3.bf16.msra.mxu1 %v2428_v17  ;;  %v1701_v17 = vld [vmem:[#allocation25 + $0x50] sm:$0xff] }
 0x83c   :  { %2433 = vmatprep.subr.bf16.mxu1 %v2432_v20  ;;  %v2464_v19 = vpack.c.bf16 %v1702_v18, %v1701_v17 }
 0x83f   :  { %2435 = vmatpush3.bf16.msra.mxu1 %v2432_v20  ;;  %v1703_v20 = vld [vmem:[#allocation25 + $0x60] sm:$0xff] }
 0x840   :  { %2437 = vmatprep.subr.bf16.mxu1 %v2436_v24  ;;  %v2468_v22 = vpack.c.bf16 %v1704_v21, %v1703_v20 }
 0x843   :  { %2439 = vmatpush3.bf16.msra.mxu1 %v2436_v24  ;;  %v1706_v24 = vld [vmem:[#allocation25 + $0x78] sm:$0xff] }
 0x844   :  { %2441 = vmatprep.subr.bf16.mxu1 %v2440_v26  ;;  %v2472_v25 = vpack.c.bf16 %v1706_v24, %v1705_v23 }
 0x847   :  { %2443 = vmatpush3.bf16.msra.mxu1 %v2440_v26  ;;  %v1916_v26 = vld [vmem:[#allocation23] ss:$0 sm:$0xff] }
 0x8b6   :  { %v1384_v54 = vpop.xlane.xlu0 %1383 }
 0x8b7   :  { %v1387_v55 = vmax.f32 %v1384_v54, 1e-24 }
 0x8b9   :  { %2522 = vrsqrt.f32 %v1387_v55 }
 0x8ba   :  { %v1386_v56 = vpop.xlane.xlu0 %1385 }
 0x8bb   :  { %v1388_v57 = vmax.f32 %v1386_v56, 1e-24 }
 0x8bd   :  { %2524 = vrsqrt.f32 %v1388_v57 }
 0x8c3   :  { %v2523_v58 = vpop.eup %2522 }
 0x8c4   :  { %v1391_v61 = vmul.f32 %v2523_v58, %v3396_v6  ;;  %v1696_v6 = vld [vmem:[#allocation25 + $0x28] sm:$0xff] }
 0x8c5   :  { %v2452_v13 = vpack.c.bf16 %v1696_v6, %v1695_v59 }
 0x8c6   :  { %2158 = vmatprep.mubr.f32.mxu1 %v1391_v61  ;;  %1791 = vst [vmem:[#allocation29] sm:$0xff] %v1391_v61 }
 0x8c7   :  { %v2525_v62 = vpop.eup %2524 }
 0x8c8   :  { %v1392_v63 = vmul.f32 %v2525_v62, %v3400_v12  ;;  %v1697_v12 = vld [vmem:[#allocation25 + $0x30] sm:$0xff] }
 0x8c9   :  { %v2456_v15 = vpack.c.bf16 %v1698_v14, %v1697_v12 }
 0x8ca   :  { %2159 = vmatmul.mubr.f32.vlgmr.msra.gmra.mrb[14].mxu1 %v1392_v63  ;;  %1792 = vst [vmem:[#allocation29 + $0x8] sm:$0xff] %v1392_v63 }
 0x8fd   :  { %v2090_v2 = vpop.f32.mrb[12].mxu1 }
 0x8fe   :  { %v1488_v3 = vadd.f32 %v2090_v2, %v1914_v1  ;;  %v1482_v4 = vpop.f32.mrb[13].mxu1 }
 0x8ff   :  { %v1483_v5 = vadd.f32 %v1914_v1, %v1482_v4 }
 0x900   :  { %v1492_v10 = vmax.f32 %v1488_v3, 0.0 }
 0x901   :  { %v1491_v9 = vmax.f32 %v1483_v5, 0.0 }
 0x903   :  { %2123 = vmatprep.mubr.f32.mxu0 %v1491_v9 }
 0x904   :  { %2124 = vmatmul.mubr.f32.vlgmr.msra.gmra.mrb[12].mxu0 %v1492_v10 }
 0x905   :  { %2447 = vmatpush3.bf16.msra.mxu0 %v2444_v53 }
 0x906   :  { %2449 = vmatprep.subr.bf16.mxu0 %v2448_v11 }
 0x909   :  { %2451 = vmatpush3.bf16.msra.mxu0 %v2448_v11 }
 0x90a   :  { %2453 = vmatprep.subr.bf16.mxu0 %v2452_v13 }
 0x90d   :  { %2455 = vmatpush3.bf16.msra.mxu0 %v2452_v13 }
 0x90e   :  { %2457 = vmatprep.subr.bf16.mxu0 %v2456_v15 }
 0x911   :  { %2459 = vmatpush3.bf16.msra.mxu0 %v2456_v15 }
 0x912   :  { %2461 = vmatprep.subr.bf16.mxu0 %v2460_v16 }
 0x915   :  { %2463 = vmatpush3.bf16.msra.mxu0 %v2460_v16 }
 0x916   :  { %2465 = vmatprep.subr.bf16.mxu0 %v2464_v19 }
 0x919   :  { %2467 = vmatpush3.bf16.msra.mxu0 %v2464_v19 }
 0x91a   :  { %2469 = vmatprep.subr.bf16.mxu0 %v2468_v22 }
 0x91d   :  { %2471 = vmatpush3.bf16.msra.mxu0 %v2468_v22 }
 0x91e   :  { %2473 = vmatprep.subr.bf16.mxu0 %v2472_v25 }
 0x921   :  { %2475 = vmatpush3.bf16.msra.mxu0 %v2472_v25 }
 0x99d   :  { %v2160_v27 = vpop.f32.mrb[14].mxu1 }
 0x99e   :  { %v1686_v28 = vadd.f32 %v2160_v27, %v1916_v26  ;;  %v1680_v29 = vpop.f32.mrb[15].mxu1 }
 0x99f   :  { %v1681_v30 = vadd.f32 %v1916_v26, %v1680_v29 }
 0x9a0   :  { %v1690_v32 = vmax.f32 %v1686_v28, 0.0 }
 0x9a1   :  { %v1689_v31 = vmax.f32 %v1681_v30, 0.0 }
 0x9a3   :  { %2193 = vmatprep.mubr.f32.mxu0 %v1689_v31 }
 0x9a4   :  { %2194 = vmatmul.mubr.f32.vlgmr.msra.gmra.mrb[14].mxu0 %v1690_v32 }
 0x9d7   :  { %v2125_v34 = vpop.f32.mrb[12].mxu0 }
 0x9d8   :  { %v1588_v35 = vadd.f32 %v2125_v34, %v1915_v33  ;;  %v1582_v36 = vpop.f32.mrb[13].mxu0 }
 0x9d9   :  { %v1583_v37 = vadd.f32 %v1915_v33, %v1582_v36 }
 0x9da   :  { %v1794_v38 = vmul.f32 %v1588_v35, %v1588_v35 }
 0x9db   :  { %v1793_v39 = vmul.f32 %v1583_v37, %v1583_v37 }
 0x9dc   :  { %1797 = vadd.xlane.f32.xlu1 %v1794_v38 }
 0x9e0   :  { %1795 = vadd.xlane.f32.xlu1 %v1793_v39 }
 0xa69   :  { %v1798_v40 = vpop.xlane.xlu1 %1797 }
 0xa6a   :  { %v1800_v41 = vmax.f32 %v1798_v40, 1e-24 }
 0xa6c   :  { %2526 = vrsqrt.f32 %v1800_v41 }
 0xa6d   :  { %v1796_v42 = vpop.xlane.xlu1 %1795 }
 0xa6e   :  { %v1799_v51 = vmax.f32 %v1796_v42, 1e-24 }
 0xa70   :  { %2528 = vrsqrt.f32 %v1799_v51 }
 0xa76   :  { %v2527_v0 = vpop.eup %2526 }
 0xa77   :  { %v2195_v44 = vpop.f32.mrb[14].mxu0  ;;  %v1804_v45 = vmul.f32 %v2527_v0, %v1588_v35 }
 0xa78   :  { %v3406_v46 = vadd.f32 %v2195_v44, %v1917_v43  ;;  %v1780_v47 = vpop.f32.mrb[15].mxu0 }
 0xa79   :  { %v3408_v48 = vadd.f32 %v1917_v43, %v1780_v47  ;;  %1806 = vst [vmem:[#allocation31 + $0x8] sm:$0xff] %v1804_v45 }
 0xa7a   :  { %v2529_v49 = vpop.eup %2528  ;;  %v1808_v50 = vmul.f32 %v3406_v46, %v3406_v46 }
 0xa7b   :  { %v1807_v53 = vmul.f32 %v3408_v48, %v3408_v48  ;;  %v1803_v54 = vmul.f32 %v2529_v49, %v1583_v37 }
 0xa7c   :  { %1811 = vadd.xlane.f32.xlu1 %v1808_v50 }
 0xa7d   :  { %1809 = vadd.xlane.f32.xlu0 %v1807_v53  ;;  %1805 = vst [vmem:[#allocation31] sm:$0xff] %v1803_v54 }
 0xa7e   :  { %2897 = shalt.err (!%p2894_p6)
}
 0xa7f   :  { %s2898_s1 = scalar_lea.hbm %s3500_s17, 256 }
 0xa80   :  { %p2899_p7 = scmp.ne.s32.totalorder %s3500_s17, %s2898_s1  ;;  %p2902_p8 = scmp.lt.u32.totalorder %s2898_s1, %s3500_s17 }
 0xa82   :  { %p2904_p9 = pnand %p2902_p8, %p2899_p7 }
 0xa84   :  { %2907 = shalt.err (!%p2904_p9)
}
 0xa85   :  { %1844 = dma.vmem_to_hbm [thread:$0]  %s1839_s30, 256, %s3500_s17, [#allocation30], %s3523_s18, %s3523_s18, %s3522_s13  }
 0xa86   :  { %s2908_s27 = scalar_lea.vmem %s3414_s19, 256  ;;  %p2913_p11 = scmp.lt.s32.totalorder %s3414_s19, %s3414_s19 }
 0xa87   :  { %p2909_p10 = scmp.ne.s32.totalorder %s3414_s19, %s2908_s27  ;;  %p2914_p12 = scmp.lt.s32.totalorder %s2908_s27, %s2908_s27 }
 0xa89   :  { %p2915_p13 = por %p2914_p12, %p2913_p11 }
 0xa8b   :  { %p2916_p0 = pnand %p2915_p13, %p2909_p10 }
 0xa8d   :  { %2919 = shalt.err (!%p2916_p0)
}
 0xa8e   :  { %s2920_s21 = scalar_lea.hbm %s3499_s16, 256 }
 0xa8f   :  { %p2921_p1 = scmp.ne.s32.totalorder %s3499_s16, %s2920_s21  ;;  %p2924_p2 = scmp.lt.u32.totalorder %s2920_s21, %s3499_s16 }
 0xa91   :  { %p2926_p3 = pnand %p2924_p2, %p2921_p1 }
 0xa93   :  { %2929 = shalt.err (!%p2926_p3)
}
 0xa94   :  { %1832 = dma.vmem_to_hbm [thread:$0]  %s3414_s19, 256, %s3499_s16, [#allocation4], %s3523_s18, %s3523_s18, %s3522_s13  }
 0xa95   :  { %s3022_s5 = smov [#allocation31]  }
 0xa96   :  { %s1850_s6 = sshll.u32 %s3022_s5, 4  ;;  %s1851_s6 = int_to_ptr.vmem [resolvable:$true] %s1850_s6 }
 0xa97   :  { %s2930_s14 = scalar_lea.vmem %s1851_s6, 256  ;;  %p2935_p5 = scmp.lt.s32.totalorder %s1851_s6, %s1851_s6 }
 0xa98   :  { %p2931_p4 = scmp.ne.s32.totalorder %s1851_s6, %s2930_s14  ;;  %p2936_p6 = scmp.lt.s32.totalorder %s2930_s14, %s2930_s14 }
 0xa9a   :  { %p2937_p7 = por %p2936_p6, %p2935_p5 }
 0xa9c   :  { %p2938_p8 = pnand %p2937_p7, %p2931_p4 }
 0xa9e   :  { %2941 = shalt.err (!%p2938_p8)
}
 0xa9f   :  { %s3525_s30 = sld [smem:[#allocation50_spill]] }
 0xaa5   :  { %s2942_s9 = scalar_lea.hbm %s3525_s30, 256 }
 0xaa6   :  { %p2943_p9 = scmp.ne.s32.totalorder %s3525_s30, %s2942_s9  ;;  %p2946_p10 = scmp.lt.u32.totalorder %s2942_s9, %s3525_s30 }
 0xaa8   :  { %p2948_p11 = pnand %p2946_p10, %p2943_p9 }
 0xaaa   :  { %2951 = shalt.err (!%p2948_p11)
}
 0xaab   :  { %1856 = dma.vmem_to_hbm [thread:$0]  %s1851_s6, 256, %s3525_s30, [#allocation30], %s3523_s18, %s3523_s18, %s3522_s13  }
 0xaac   :  { %s3023_s28 = smov [#allocation32]  }
 0xaad   :  { %s1862_s4 = sshll.u32 %s3023_s28, 4  ;;  %s1863_s4 = int_to_ptr.vmem [resolvable:$true] %s1862_s4 }
 0xaae   :  { %s2952_s2 = scalar_lea.vmem %s1863_s4, 256  ;;  %p2957_p13 = scmp.lt.s32.totalorder %s1863_s4, %s1863_s4 }
 0xaaf   :  { %p2953_p12 = scmp.ne.s32.totalorder %s1863_s4, %s2952_s2  ;;  %p2958_p0 = scmp.lt.s32.totalorder %s2952_s2, %s2952_s2 }
 0xab1   :  { %p2959_p1 = por %p2958_p0, %p2957_p13 }
 0xab3   :  { %p2960_p2 = pnand %p2959_p1, %p2953_p12 }
 0xb09   :  { %v1812_v55 = vpop.xlane.xlu1 %1811 }
 0xb0a   :  { %v1814_v56 = vmax.f32 %v1812_v55, 1e-24  ;;  %v1810_v57 = vpop.xlane.xlu0 %1809 }
 0xb0b   :  { %v1813_v58 = vmax.f32 %v1810_v57, 1e-24 }
 0xb0c   :  { %2530 = vrsqrt.f32 %v1814_v56 }
 0xb0d   :  { %2532 = vrsqrt.f32 %v1813_v58 }
 0xb16   :  { %v2531_v61 = vpop.eup %2530 }
 0xb17   :  { %v2533_v62 = vpop.eup %2532  ;;  %v1818_v63 = vmul.f32 %v2531_v61, %v3406_v46 }
 0xb18   :  { %v1817_v1 = vmul.f32 %v2533_v62, %v3408_v48 }
 0xb19   :  { %1820 = vst [vmem:[#allocation32 + $0x8] sm:$0xff] %v1818_v63 }
 0xb1a   :  { %1819 = vst [vmem:[#allocation32] sm:$0xff] %v1817_v1 }
 0xb1b   :  { %2963 = shalt.err (!%p2960_p2)
}
 0xb1c   :  { %s3526_s12 = sld [smem:[#allocation51_spill]] }
 0xb22   :  { %s2964_s27 = scalar_lea.hbm %s3526_s12, 256 }
 0xb23   :  { %p2965_p3 = scmp.ne.s32.totalorder %s3526_s12, %s2964_s27  ;;  %p2968_p4 = scmp.lt.u32.totalorder %s2964_s27, %s3526_s12 }
 0xb25   :  { %p2970_p5 = pnand %p2968_p4, %p2965_p3 }
 0xb27   :  { %2973 = shalt.err (!%p2970_p5)
}
 0xb28   :  { %1868 = dma.vmem_to_hbm [thread:$0]  %s1863_s4, 256, %s3526_s12, [#allocation33], %s3523_s18, %s3523_s18, %s3522_s13  }
 0xb29   :  { %2992 = dma.done.wait [#allocation4], 256  }
 0xb2a   :  { %2993 = vsyncadd [#allocation4], 4294967040 }
 0xb2b   :  { %2994 = dma.done.wait [#allocation30], 512  }
 0xb2c   :  { %2995 = vsyncadd [#allocation30], 4294966784 }
 0xb2d   :  { %2996 = dma.done.wait [#allocation33], 256  }
 0xb2e   :  { %2997 = vsyncadd [#allocation33], 4294967040 }
 0xb2f   :  { %1881 = vsyncpa [#allocation3], 1 }
 0xb30   :  { %1882 = vsyncpa [#allocation6], 1 }
 0xb31   :  { %1883 = vsyncpa [#allocation9], 1 }
 0xb32   :  { %1884 = vsyncpa [#allocation12], 1 }
 0xb33   :  { %1885 = vsyncpa [#allocation15], 1 }
 0xb34   :  { %1886 = vsyncpa [#allocation18], 1 }
 0xb35   :  { %1887 = vsyncpa [#allocation21], 1 }
 0xb36   :  { %1888 = vsyncpa [#allocation24], 1 }
 0xb37   :  { %1889 = vsyncpa [#allocation27], 1 }
 0xb38   :  { %1890 = vsyncpa [#allocation4], 1 }
 0xb39   :  { %1891 = vsyncpa [#allocation30], 1 }
 0xb3a   :  { %1892 = vsyncpa [#allocation33], 1 }

</bundles_post_ra>
